<compile_context>
chip_gen: v7x
topology: tpu7x:2x2x1
jax: 0.10.0
libtpu: 0.0.40
codegen_flags: <defaults>
</compile_context>

<pallas_src>
import functools
import math

import jax
import jax.numpy as jnp
from jax.experimental import pallas as pl
from jax.experimental.pallas import tpu as pltpu


def _layernorm(v, w, b, eps=1e-5):
    mu = jnp.mean(v, axis=-1, keepdims=True)
    var = jnp.mean((v - mu) ** 2, axis=-1, keepdims=True)
    return (v - mu) * jax.lax.rsqrt(var + eps) * w + b


def _encoder_stack_kernel(x_ref, wqkv_ref, bqkv_ref, wo_ref, bo_ref,
                          w1_ref, b1_ref, w2_ref, b2_ref,
                          n1w_ref, n1b_ref, n2w_ref, n2b_ref,
                          nfw_ref, nfb_ref,
                          out_ref, act_ref, *, E, H, apply_final_norm):
    l = pl.program_id(1)                      # layer index (inner, sequential)
    n_layers = pl.num_programs(1)
    Bt, S, _ = act_ref.shape
    hd = E // H
    R = Bt * S
    bf16 = jnp.bfloat16

    # Load the fresh input into the carried residual stream on the first layer of each tile.
    @pl.when(l == 0)
    def _():
        act_ref[...] = x_ref[...].astype(jnp.float32)

    x = act_ref[...]                          # (Bt, S, E) f32 residual stream
    x2d = x.reshape(R, E)
    xb = x2d.astype(bf16)

    # ---- fused QKV projection (1/sqrt(hd) already folded into the Q columns) ----
    qkv = jnp.dot(xb, wqkv_ref[0], preferred_element_type=jnp.float32) + bqkv_ref[0]
    qkvb = qkv.astype(bf16)                   # single cast of the whole (R, 3E) buffer

    # ---- multi-head self-attention, batched over the batch tile ----
    # TODO(synk): src_mask / src_key_padding_mask would enter here as an additive bias on the
    # per-head (Bt, S, S) score tensor; not implemented (module is exercised with None masks).
    attn = None
    for h in range(H):                        # static unroll over heads
        lo = h * hd
        q_h = qkvb[:, lo:lo + hd].reshape(Bt, S, hd)
        k_h = qkvb[:, E + lo:E + lo + hd].reshape(Bt, S, hd)
        v_h = qkvb[:, 2 * E + lo:2 * E + lo + hd].reshape(Bt, S, hd)

        s = jnp.einsum('bqd,bkd->bqk', q_h, k_h,
                       preferred_element_type=jnp.float32)           # (Bt, S, S)
        s = s - jnp.max(s, axis=-1, keepdims=True)
        p = jnp.exp(s)
        p = p * pl.reciprocal(jnp.sum(p, axis=-1, keepdims=True), approx=True)

        ctx = jnp.einsum('bqk,bkd->bqd', p.astype(bf16), v_h,
                         preferred_element_type=jnp.float32)          # (Bt, S, hd)
        # Fold the head back through its slice of the output projection (no concatenate).
        contrib = jnp.dot(ctx.reshape(R, hd).astype(bf16), wo_ref[0, h],
                          preferred_element_type=jnp.float32)         # (R, E)
        attn = contrib if attn is None else attn + contrib
    attn = attn + bo_ref[0]

    # residual + norm1 (post-norm, PyTorch default; dropout = identity in eval mode)
    x1 = _layernorm(x2d + attn, n1w_ref[0], n1b_ref[0])

    # ---- feed forward (relu) ----
    h1 = jnp.maximum(
        jnp.dot(x1.astype(bf16), w1_ref[0], preferred_element_type=jnp.float32)
        + b1_ref[0], 0.0)
    h2 = jnp.dot(h1.astype(bf16), w2_ref[0], preferred_element_type=jnp.float32) + b2_ref[0]

    # residual + norm2
    x2 = _layernorm(x1 + h2, n2w_ref[0], n2b_ref[0])

    # Carry the residual stream to the next layer (skip the dead store on the last layer).
    @pl.when(l < n_layers - 1)
    def _():
        act_ref[...] = x2.reshape(Bt, S, E)

    # Last layer: optionally apply the encoder's final LayerNorm, emit the output block.
    @pl.when(l == n_layers - 1)
    def _():
        y = _layernorm(x2, nfw_ref[...], nfb_ref[...]) if apply_final_norm else x2
        out_ref[...] = y.reshape(Bt, S, E).astype(out_ref.dtype)


def transformer_encoder_forward(src_sbe, stacked, final_norm, nhead, *, batch_tile=None):
    """src_sbe: (S, B, E) like PyTorch nn.TransformerEncoder. Returns (S, B, E)."""
    S, B, E = src_sbe.shape
    L = stacked['wqkv'].shape[0]
    H = nhead
    assert E % H == 0

    if batch_tile is None:
        batch_tile = B
    assert B % batch_tile == 0
    nb = B // batch_tile

    apply_final = final_norm is not None
    nfw = final_norm['w'] if apply_final else jnp.ones((1, E), jnp.float32)
    nfb = final_norm['b'] if apply_final else jnp.zeros((1, E), jnp.float32)

    # Batch-first layout inside the kernel: one transpose per whole stack (not per layer),
    # which lets every attention einsum use a leading batch dimension.
    x_bse = jnp.transpose(src_sbe, (1, 0, 2))          # (B, S, E)

    def stacked_spec(arr):                              # per-layer weight: index by layer l
        nd = arr.ndim
        return pl.BlockSpec((1,) + arr.shape[1:],
                            lambda b, l, _nd=nd: (l,) + (0,) * (_nd - 1))

    def const_spec(arr):                                # grid-invariant (final norm) weights
        nd = arr.ndim
        return pl.BlockSpec(arr.shape, lambda b, l, _nd=nd: (0,) * _nd)

    names = ['wqkv', 'bqkv', 'wo', 'bo', 'w1', 'b1', 'w2', 'b2',
             'n1w', 'n1b', 'n2w', 'n2b']
    weight_args = [stacked[n] for n in names]

    in_specs = ([pl.BlockSpec((batch_tile, S, E), lambda b, l: (b, 0, 0))]
                + [stacked_spec(a) for a in weight_args]
                + [const_spec(nfw), const_spec(nfb)])

    kernel = functools.partial(_encoder_stack_kernel, E=E, H=H,
                               apply_final_norm=apply_final)

    out_bse = pl.pallas_call(
        kernel,
        out_shape=jax.ShapeDtypeStruct((B, S, E), src_sbe.dtype),
        grid_spec=pltpu.PrefetchScalarGridSpec(
            num_scalar_prefetch=0,
            grid=(nb, L),                               # layer axis innermost: weight DMA
            in_specs=in_specs,                          # for layer l+1 overlaps layer l
            out_specs=pl.BlockSpec((batch_tile, S, E), lambda b, l: (b, 0, 0)),
            scratch_shapes=[pltpu.VMEM((batch_tile, S, E), jnp.float32)],
        ),
        compiler_params=pltpu.CompilerParams(
            dimension_semantics=("parallel", "arbitrary"),
            vmem_limit_bytes=64 * 1024 * 1024,
        ),
    )(x_bse, *weight_args, nfw, nfb)

    return jnp.transpose(out_bse, (1, 0, 2))            # back to (S, B, E)


def init_params(key, num_layers, E, H, FF):
    """Weights pre-transposed (y = x @ W + b), stacked over a leading layer axis.
    Matmul weights in bf16 (MXU-native); biases / norm params in f32.
    The attention scale 1/sqrt(E//H) is folded into the Q part of the fused QKV weights."""
    hd = E // H
    scale = 1.0 / math.sqrt(hd)
    L = num_layers

    def rn(k, shape, s=0.05):
        return (s * jax.random.normal(k, shape)).astype(jnp.float32)

    keys = jax.random.split(key, 8)
    wqkv = rn(keys[0], (L, E, 3 * E))
    bqkv = rn(keys[1], (L, 1, 3 * E))
    wqkv = wqkv.at[:, :, :E].multiply(scale)            # fold softmax scale (zero runtime cost)
    bqkv = bqkv.at[:, :, :E].multiply(scale)

    wo = rn(keys[2], (L, E, E)).reshape(L, H, hd, E)    # rows grouped by (head, head_dim)
    bo = rn(keys[3], (L, 1, E))
    w1 = rn(keys[4], (L, E, FF))
    b1 = rn(keys[5], (L, 1, FF))
    w2 = rn(keys[6], (L, FF, E))
    b2 = rn(keys[7], (L, 1, E))

    stacked = dict(
        wqkv=wqkv.astype(jnp.bfloat16), bqkv=bqkv,
        wo=wo.astype(jnp.bfloat16), bo=bo,
        w1=w1.astype(jnp.bfloat16), b1=b1,
        w2=w2.astype(jnp.bfloat16), b2=b2,
        n1w=jnp.ones((L, 1, E), jnp.float32), n1b=jnp.zeros((L, 1, E), jnp.float32),
        n2w=jnp.ones((L, 1, E), jnp.float32), n2b=jnp.zeros((L, 1, E), jnp.float32),
    )
    final = dict(w=jnp.ones((1, E), jnp.float32), b=jnp.zeros((1, E), jnp.float32))
    return stacked, final


if __name__ == "__main__":
    # Shapes consistent with nn.TransformerEncoder(src=(S, B, E)); E=128 keeps stores lane-dense.
    S, B, E, H, FF, NUM_LAYERS = 8, 2, 128, 4, 256, 2

    key = jax.random.PRNGKey(0)
    kp, kx = jax.random.split(key)
    params, final_norm = init_params(kp, NUM_LAYERS, E, H, FF)

    src = jax.random.normal(kx, (S, B, E), dtype=jnp.float32)

    fwd = jax.jit(functools.partial(transformer_encoder_forward, nhead=H))
    out = fwd(src, params, final_norm)
    out = jax.block_until_ready(out)

    assert out.shape == (S, B, E) and out.dtype == jnp.float32
    assert bool(jnp.all(jnp.isfinite(out)))
    print("KERNEL_OK")
</pallas_src>

<mosaic_0001>
module attributes {stable_mosaic.version = 11 : i64} {
  func.func @_encoder_stack_kernel(%arg0: i32, %arg1: i32, %arg2: memref<2x8x128xf32, #tpu.memory_space<vmem>>, %arg3: memref<1x128x384xbf16, #tpu.memory_space<vmem>>, %arg4: memref<1x1x384xf32, #tpu.memory_space<vmem>>, %arg5: memref<1x4x32x128xbf16, #tpu.memory_space<vmem>>, %arg6: memref<1x1x128xf32, #tpu.memory_space<vmem>>, %arg7: memref<1x128x256xbf16, #tpu.memory_space<vmem>>, %arg8: memref<1x1x256xf32, #tpu.memory_space<vmem>>, %arg9: memref<1x256x128xbf16, #tpu.memory_space<vmem>>, %arg10: memref<1x1x128xf32, #tpu.memory_space<vmem>>, %arg11: memref<1x1x128xf32, #tpu.memory_space<vmem>>, %arg12: memref<1x1x128xf32, #tpu.memory_space<vmem>>, %arg13: memref<1x1x128xf32, #tpu.memory_space<vmem>>, %arg14: memref<1x1x128xf32, #tpu.memory_space<vmem>>, %arg15: memref<1x128xf32, #tpu.memory_space<vmem>>, %arg16: memref<1x128xf32, #tpu.memory_space<vmem>>, %arg17: memref<2x8x128xf32, #tpu.memory_space<vmem>>, %arg18: memref<2x8x128xf32, #tpu.memory_space<vmem>>) attributes {dimension_semantics = [#tpu.dimension_semantics<parallel>, #tpu.dimension_semantics<arbitrary>], iteration_bounds = array<i64: 1, 2>, scalar_prefetch = 0 : i64, scratch_operands = 1 : i64, tpu.core_type = #tpu.core_type<tc>, window_params = [{transform_indices = @transform_0, window_bounds = array<i64: 2, 8, 128>}, {transform_indices = @transform_1, window_bounds = array<i64: 1, 128, 384>}, {transform_indices = @transform_2, window_bounds = array<i64: 1, 1, 384>}, {transform_indices = @transform_3, window_bounds = array<i64: 1, 4, 32, 128>}, {transform_indices = @transform_4, window_bounds = array<i64: 1, 1, 128>}, {transform_indices = @transform_5, window_bounds = array<i64: 1, 128, 256>}, {transform_indices = @transform_6, window_bounds = array<i64: 1, 1, 256>}, {transform_indices = @transform_7, window_bounds = array<i64: 1, 256, 128>}, {transform_indices = @transform_8, window_bounds = array<i64: 1, 1, 128>}, {transform_indices = @transform_9, window_bounds = array<i64: 1, 1, 128>}, {transform_indices = @transform_10, window_bounds = array<i64: 1, 1, 128>}, {transform_indices = @transform_11, window_bounds = array<i64: 1, 1, 128>}, {transform_indices = @transform_12, window_bounds = array<i64: 1, 1, 128>}, {pipeline_mode = #tpu.pipeline_mode<synchronous>, transform_indices = @transform_13, window_bounds = array<i64: 1, 128>}, {pipeline_mode = #tpu.pipeline_mode<synchronous>, transform_indices = @transform_14, window_bounds = array<i64: 1, 128>}, {transform_indices = @transform_15, window_bounds = array<i64: 2, 8, 128>}]} {
    %c0_i32 = arith.constant 0 : i32
    %0 = arith.cmpi eq, %arg1, %c0_i32 : i32
    %1 = arith.extui %0 : i1 to i32
    %c0_i32_0 = arith.constant 0 : i32
    %2 = arith.cmpi ne, %1, %c0_i32_0 : i32
    scf.if %2 {
      %c0_85 = arith.constant 0 : index
      %c0_86 = arith.constant 0 : index
      %c0_87 = arith.constant 0 : index
      %195 = vector.load %arg2[%c0_85, %c0_86, %c0_87] : memref<2x8x128xf32, #tpu.memory_space<vmem>>, vector<2x8x128xf32>
      %c0_88 = arith.constant 0 : index
      %c0_89 = arith.constant 0 : index
      %c0_90 = arith.constant 0 : index
      %196 = vector.load %arg18[%c0_88, %c0_89, %c0_90] : memref<2x8x128xf32, #tpu.memory_space<vmem>>, vector<2x8x128xf32>
      tpu.vector_store %arg18[%c0_88, %c0_89, %c0_90], %195 {strides = array<i32>} : memref<2x8x128xf32, #tpu.memory_space<vmem>>, vector<2x8x128xf32>,
    } else {
    }
    %c0 = arith.constant 0 : index
    %c0_1 = arith.constant 0 : index
    %c0_2 = arith.constant 0 : index
    %3 = vector.load %arg18[%c0, %c0_1, %c0_2] : memref<2x8x128xf32, #tpu.memory_space<vmem>>, vector<2x8x128xf32>
    %4 = vector.shape_cast %3 : vector<2x8x128xf32> to vector<16x128xf32>
    %5 = arith.truncf %4 : vector<16x128xf32> to vector<16x128xbf16>
    %c0_3 = arith.constant 0 : index
    %c0_4 = arith.constant 0 : index
    %c0_5 = arith.constant 0 : index
    %6 = vector.load %arg3[%c0_3, %c0_4, %c0_5] : memref<1x128x384xbf16, #tpu.memory_space<vmem>>, vector<1x128x384xbf16>
    %7 = vector.shape_cast %6 : vector<1x128x384xbf16> to vector<128x384xbf16>
    %cst = arith.constant dense<0.000000e+00> : vector<16x384xf32>
    %8 = tpu.matmul %5, %7, %cst {dimension_numbers = #tpu.dot_dimension_numbers<[1], [0], [0], [1], [0, 0, 1, 1], [], []>} : vector<16x128xbf16>, vector<128x384xbf16>, vector<16x384xf32> -> vector<16x384xf32>
    %c0_6 = arith.constant 0 : index
    %c0_7 = arith.constant 0 : index
    %c0_8 = arith.constant 0 : index
    %9 = vector.load %arg4[%c0_6, %c0_7, %c0_8] : memref<1x1x384xf32, #tpu.memory_space<vmem>>, vector<1x1x384xf32>
    %10 = vector.shape_cast %9 : vector<1x1x384xf32> to vector<1x384xf32>
    %11 = vector.broadcast %10 : vector<1x384xf32> to vector<16x384xf32>
    %12 = arith.addf %8, %11 : vector<16x384xf32>
    %13 = arith.truncf %12 : vector<16x384xf32> to vector<16x384xbf16>
    %14 = vector.extract_strided_slice %13 {offsets = [0, 0], sizes = [16, 32], strides = [1, 1]} : vector<16x384xbf16> to vector<16x32xbf16>
    %15 = vector.shape_cast %14 : vector<16x32xbf16> to vector<2x8x32xbf16>
    %16 = vector.extract_strided_slice %13 {offsets = [0, 128], sizes = [16, 32], strides = [1, 1]} : vector<16x384xbf16> to vector<16x32xbf16>
    %17 = vector.shape_cast %16 : vector<16x32xbf16> to vector<2x8x32xbf16>
    %18 = vector.extract_strided_slice %13 {offsets = [0, 256], sizes = [16, 32], strides = [1, 1]} : vector<16x384xbf16> to vector<16x32xbf16>
    %19 = vector.shape_cast %18 : vector<16x32xbf16> to vector<2x8x32xbf16>
    "tpu.trace_start"() <{level = 10 : i32, message = "bqd,bkd->bqk"}> : () -> ()
    %cst_9 = arith.constant dense<0.000000e+00> : vector<2x8x8xf32>
    %20 = tpu.matmul %15, %17, %cst_9 {dimension_numbers = #tpu.dot_dimension_numbers<[2], [2], [1], [1], [0, 0, 0, 1, 1, 1], [0], [0]>} : vector<2x8x32xbf16>, vector<2x8x32xbf16>, vector<2x8x8xf32> -> vector<2x8x8xf32>
    "tpu.trace_stop"() : () -> ()
    %cst_10 = arith.constant dense<0xFF800000> : vector<2x8xf32>
    %21 = vector.multi_reduction <maximumf>, %20, %cst_10 [2] : vector<2x8x8xf32> to vector<2x8xf32>
    %22 = vector.shape_cast %21 : vector<2x8xf32> to vector<2x8x1xf32>
    %23 = vector.broadcast %22 : vector<2x8x1xf32> to vector<2x8x8xf32>
    %24 = arith.subf %20, %23 : vector<2x8x8xf32>
    %25 = math.exp %24 : vector<2x8x8xf32>
    %cst_11 = arith.constant dense<0.000000e+00> : vector<2x8xf32>
    %26 = vector.multi_reduction <add>, %25, %cst_11 [2] : vector<2x8x8xf32> to vector<2x8xf32>
    %27 = vector.shape_cast %26 : vector<2x8xf32> to vector<2x8x1xf32>
    %28 = tpu.reciprocal %27 {approx = true} : vector<2x8x1xf32> -> vector<2x8x1xf32>
    %29 = vector.broadcast %28 : vector<2x8x1xf32> to vector<2x8x8xf32>
    %30 = arith.mulf %25, %29 : vector<2x8x8xf32>
    %31 = arith.truncf %30 : vector<2x8x8xf32> to vector<2x8x8xbf16>
    "tpu.trace_start"() <{level = 10 : i32, message = "bqk,bkd->bqd"}> : () -> ()
    %cst_12 = arith.constant dense<0.000000e+00> : vector<2x8x32xf32>
    %32 = tpu.matmul %31, %19, %cst_12 {dimension_numbers = #tpu.dot_dimension_numbers<[2], [1], [1], [2], [0, 0, 0, 1, 1, 2], [0], [0]>} : vector<2x8x8xbf16>, vector<2x8x32xbf16>, vector<2x8x32xf32> -> vector<2x8x32xf32>
    "tpu.trace_stop"() : () -> ()
    %33 = vector.shape_cast %32 : vector<2x8x32xf32> to vector<16x32xf32>
    %34 = arith.truncf %33 : vector<16x32xf32> to vector<16x32xbf16>
    %c0_13 = arith.constant 0 : index
    %c0_14 = arith.constant 0 : index
    %c0_15 = arith.constant 0 : index
    %c0_16 = arith.constant 0 : index
    %35 = vector.load %arg5[%c0_13, %c0_14, %c0_15, %c0_16] : memref<1x4x32x128xbf16, #tpu.memory_space<vmem>>, vector<1x1x32x128xbf16>
    %36 = vector.shape_cast %35 : vector<1x1x32x128xbf16> to vector<32x128xbf16>
    %cst_17 = arith.constant dense<0.000000e+00> : vector<16x128xf32>
    %37 = tpu.matmul %34, %36, %cst_17 {dimension_numbers = #tpu.dot_dimension_numbers<[1], [0], [0], [1], [0, 0, 1, 1], [], []>} : vector<16x32xbf16>, vector<32x128xbf16>, vector<16x128xf32> -> vector<16x128xf32>
    %38 = vector.extract_strided_slice %13 {offsets = [0, 32], sizes = [16, 32], strides = [1, 1]} : vector<16x384xbf16> to vector<16x32xbf16>
    %39 = vector.shape_cast %38 : vector<16x32xbf16> to vector<2x8x32xbf16>
    %40 = vector.extract_strided_slice %13 {offsets = [0, 160], sizes = [16, 32], strides = [1, 1]} : vector<16x384xbf16> to vector<16x32xbf16>
    %41 = vector.shape_cast %40 : vector<16x32xbf16> to vector<2x8x32xbf16>
    %42 = vector.extract_strided_slice %13 {offsets = [0, 288], sizes = [16, 32], strides = [1, 1]} : vector<16x384xbf16> to vector<16x32xbf16>
    %43 = vector.shape_cast %42 : vector<16x32xbf16> to vector<2x8x32xbf16>
    "tpu.trace_start"() <{level = 10 : i32, message = "bqd,bkd->bqk"}> : () -> ()
    %cst_18 = arith.constant dense<0.000000e+00> : vector<2x8x8xf32>
    %44 = tpu.matmul %39, %41, %cst_18 {dimension_numbers = #tpu.dot_dimension_numbers<[2], [2], [1], [1], [0, 0, 0, 1, 1, 1], [0], [0]>} : vector<2x8x32xbf16>, vector<2x8x32xbf16>, vector<2x8x8xf32> -> vector<2x8x8xf32>
    "tpu.trace_stop"() : () -> ()
    %cst_19 = arith.constant dense<0xFF800000> : vector<2x8xf32>
    %45 = vector.multi_reduction <maximumf>, %44, %cst_19 [2] : vector<2x8x8xf32> to vector<2x8xf32>
    %46 = vector.shape_cast %45 : vector<2x8xf32> to vector<2x8x1xf32>
    %47 = vector.broadcast %46 : vector<2x8x1xf32> to vector<2x8x8xf32>
    %48 = arith.subf %44, %47 : vector<2x8x8xf32>
    %49 = math.exp %48 : vector<2x8x8xf32>
    %cst_20 = arith.constant dense<0.000000e+00> : vector<2x8xf32>
    %50 = vector.multi_reduction <add>, %49, %cst_20 [2] : vector<2x8x8xf32> to vector<2x8xf32>
    %51 = vector.shape_cast %50 : vector<2x8xf32> to vector<2x8x1xf32>
    %52 = tpu.reciprocal %51 {approx = true} : vector<2x8x1xf32> -> vector<2x8x1xf32>
    %53 = vector.broadcast %52 : vector<2x8x1xf32> to vector<2x8x8xf32>
    %54 = arith.mulf %49, %53 : vector<2x8x8xf32>
    %55 = arith.truncf %54 : vector<2x8x8xf32> to vector<2x8x8xbf16>
    "tpu.trace_start"() <{level = 10 : i32, message = "bqk,bkd->bqd"}> : () -> ()
    %cst_21 = arith.constant dense<0.000000e+00> : vector<2x8x32xf32>
    %56 = tpu.matmul %55, %43, %cst_21 {dimension_numbers = #tpu.dot_dimension_numbers<[2], [1], [1], [2], [0, 0, 0, 1, 1, 2], [0], [0]>} : vector<2x8x8xbf16>, vector<2x8x32xbf16>, vector<2x8x32xf32> -> vector<2x8x32xf32>
    "tpu.trace_stop"() : () -> ()
    %57 = vector.shape_cast %56 : vector<2x8x32xf32> to vector<16x32xf32>
    %58 = arith.truncf %57 : vector<16x32xf32> to vector<16x32xbf16>
    %c0_22 = arith.constant 0 : index
    %c1 = arith.constant 1 : index
    %c0_23 = arith.constant 0 : index
    %c0_24 = arith.constant 0 : index
    %59 = vector.load %arg5[%c0_22, %c1, %c0_23, %c0_24] : memref<1x4x32x128xbf16, #tpu.memory_space<vmem>>, vector<1x1x32x128xbf16>
    %60 = vector.shape_cast %59 : vector<1x1x32x128xbf16> to vector<32x128xbf16>
    %cst_25 = arith.constant dense<0.000000e+00> : vector<16x128xf32>
    %61 = tpu.matmul %58, %60, %cst_25 {dimension_numbers = #tpu.dot_dimension_numbers<[1], [0], [0], [1], [0, 0, 1, 1], [], []>} : vector<16x32xbf16>, vector<32x128xbf16>, vector<16x128xf32> -> vector<16x128xf32>
    %62 = arith.addf %37, %61 : vector<16x128xf32>
    %63 = vector.extract_strided_slice %13 {offsets = [0, 64], sizes = [16, 32], strides = [1, 1]} : vector<16x384xbf16> to vector<16x32xbf16>
    %64 = vector.shape_cast %63 : vector<16x32xbf16> to vector<2x8x32xbf16>
    %65 = vector.extract_strided_slice %13 {offsets = [0, 192], sizes = [16, 32], strides = [1, 1]} : vector<16x384xbf16> to vector<16x32xbf16>
    %66 = vector.shape_cast %65 : vector<16x32xbf16> to vector<2x8x32xbf16>
    %67 = vector.extract_strided_slice %13 {offsets = [0, 320], sizes = [16, 32], strides = [1, 1]} : vector<16x384xbf16> to vector<16x32xbf16>
    %68 = vector.shape_cast %67 : vector<16x32xbf16> to vector<2x8x32xbf16>
    "tpu.trace_start"() <{level = 10 : i32, message = "bqd,bkd->bqk"}> : () -> ()
    %cst_26 = arith.constant dense<0.000000e+00> : vector<2x8x8xf32>
    %69 = tpu.matmul %64, %66, %cst_26 {dimension_numbers = #tpu.dot_dimension_numbers<[2], [2], [1], [1], [0, 0, 0, 1, 1, 1], [0], [0]>} : vector<2x8x32xbf16>, vector<2x8x32xbf16>, vector<2x8x8xf32> -> vector<2x8x8xf32>
    "tpu.trace_stop"() : () -> ()
    %cst_27 = arith.constant dense<0xFF800000> : vector<2x8xf32>
    %70 = vector.multi_reduction <maximumf>, %69, %cst_27 [2] : vector<2x8x8xf32> to vector<2x8xf32>
    %71 = vector.shape_cast %70 : vector<2x8xf32> to vector<2x8x1xf32>
    %72 = vector.broadcast %71 : vector<2x8x1xf32> to vector<2x8x8xf32>
    %73 = arith.subf %69, %72 : vector<2x8x8xf32>
    %74 = math.exp %73 : vector<2x8x8xf32>
    %cst_28 = arith.constant dense<0.000000e+00> : vector<2x8xf32>
    %75 = vector.multi_reduction <add>, %74, %cst_28 [2] : vector<2x8x8xf32> to vector<2x8xf32>
    %76 = vector.shape_cast %75 : vector<2x8xf32> to vector<2x8x1xf32>
    %77 = tpu.reciprocal %76 {approx = true} : vector<2x8x1xf32> -> vector<2x8x1xf32>
    %78 = vector.broadcast %77 : vector<2x8x1xf32> to vector<2x8x8xf32>
    %79 = arith.mulf %74, %78 : vector<2x8x8xf32>
    %80 = arith.truncf %79 : vector<2x8x8xf32> to vector<2x8x8xbf16>
    "tpu.trace_start"() <{level = 10 : i32, message = "bqk,bkd->bqd"}> : () -> ()
    %cst_29 = arith.constant dense<0.000000e+00> : vector<2x8x32xf32>
    %81 = tpu.matmul %80, %68, %cst_29 {dimension_numbers = #tpu.dot_dimension_numbers<[2], [1], [1], [2], [0, 0, 0, 1, 1, 2], [0], [0]>} : vector<2x8x8xbf16>, vector<2x8x32xbf16>, vector<2x8x32xf32> -> vector<2x8x32xf32>
    "tpu.trace_stop"() : () -> ()
    %82 = vector.shape_cast %81 : vector<2x8x32xf32> to vector<16x32xf32>
    %83 = arith.truncf %82 : vector<16x32xf32> to vector<16x32xbf16>
    %c0_30 = arith.constant 0 : index
    %c2 = arith.constant 2 : index
    %c0_31 = arith.constant 0 : index
    %c0_32 = arith.constant 0 : index
    %84 = vector.load %arg5[%c0_30, %c2, %c0_31, %c0_32] : memref<1x4x32x128xbf16, #tpu.memory_space<vmem>>, vector<1x1x32x128xbf16>
    %85 = vector.shape_cast %84 : vector<1x1x32x128xbf16> to vector<32x128xbf16>
    %cst_33 = arith.constant dense<0.000000e+00> : vector<16x128xf32>
    %86 = tpu.matmul %83, %85, %cst_33 {dimension_numbers = #tpu.dot_dimension_numbers<[1], [0], [0], [1], [0, 0, 1, 1], [], []>} : vector<16x32xbf16>, vector<32x128xbf16>, vector<16x128xf32> -> vector<16x128xf32>
    %87 = arith.addf %62, %86 : vector<16x128xf32>
    %88 = vector.extract_strided_slice %13 {offsets = [0, 96], sizes = [16, 32], strides = [1, 1]} : vector<16x384xbf16> to vector<16x32xbf16>
    %89 = vector.shape_cast %88 : vector<16x32xbf16> to vector<2x8x32xbf16>
    %90 = vector.extract_strided_slice %13 {offsets = [0, 224], sizes = [16, 32], strides = [1, 1]} : vector<16x384xbf16> to vector<16x32xbf16>
    %91 = vector.shape_cast %90 : vector<16x32xbf16> to vector<2x8x32xbf16>
    %92 = vector.extract_strided_slice %13 {offsets = [0, 352], sizes = [16, 32], strides = [1, 1]} : vector<16x384xbf16> to vector<16x32xbf16>
    %93 = vector.shape_cast %92 : vector<16x32xbf16> to vector<2x8x32xbf16>
    "tpu.trace_start"() <{level = 10 : i32, message = "bqd,bkd->bqk"}> : () -> ()
    %cst_34 = arith.constant dense<0.000000e+00> : vector<2x8x8xf32>
    %94 = tpu.matmul %89, %91, %cst_34 {dimension_numbers = #tpu.dot_dimension_numbers<[2], [2], [1], [1], [0, 0, 0, 1, 1, 1], [0], [0]>} : vector<2x8x32xbf16>, vector<2x8x32xbf16>, vector<2x8x8xf32> -> vector<2x8x8xf32>
    "tpu.trace_stop"() : () -> ()
    %cst_35 = arith.constant dense<0xFF800000> : vector<2x8xf32>
    %95 = vector.multi_reduction <maximumf>, %94, %cst_35 [2] : vector<2x8x8xf32> to vector<2x8xf32>
    %96 = vector.shape_cast %95 : vector<2x8xf32> to vector<2x8x1xf32>
    %97 = vector.broadcast %96 : vector<2x8x1xf32> to vector<2x8x8xf32>
    %98 = arith.subf %94, %97 : vector<2x8x8xf32>
    %99 = math.exp %98 : vector<2x8x8xf32>
    %cst_36 = arith.constant dense<0.000000e+00> : vector<2x8xf32>
    %100 = vector.multi_reduction <add>, %99, %cst_36 [2] : vector<2x8x8xf32> to vector<2x8xf32>
    %101 = vector.shape_cast %100 : vector<2x8xf32> to vector<2x8x1xf32>
    %102 = tpu.reciprocal %101 {approx = true} : vector<2x8x1xf32> -> vector<2x8x1xf32>
    %103 = vector.broadcast %102 : vector<2x8x1xf32> to vector<2x8x8xf32>
    %104 = arith.mulf %99, %103 : vector<2x8x8xf32>
    %105 = arith.truncf %104 : vector<2x8x8xf32> to vector<2x8x8xbf16>
    "tpu.trace_start"() <{level = 10 : i32, message = "bqk,bkd->bqd"}> : () -> ()
    %cst_37 = arith.constant dense<0.000000e+00> : vector<2x8x32xf32>
    %106 = tpu.matmul %105, %93, %cst_37 {dimension_numbers = #tpu.dot_dimension_numbers<[2], [1], [1], [2], [0, 0, 0, 1, 1, 2], [0], [0]>} : vector<2x8x8xbf16>, vector<2x8x32xbf16>, vector<2x8x32xf32> -> vector<2x8x32xf32>
    "tpu.trace_stop"() : () -> ()
    %107 = vector.shape_cast %106 : vector<2x8x32xf32> to vector<16x32xf32>
    %108 = arith.truncf %107 : vector<16x32xf32> to vector<16x32xbf16>
    %c0_38 = arith.constant 0 : index
    %c3 = arith.constant 3 : index
    %c0_39 = arith.constant 0 : index
    %c0_40 = arith.constant 0 : index
    %109 = vector.load %arg5[%c0_38, %c3, %c0_39, %c0_40] : memref<1x4x32x128xbf16, #tpu.memory_space<vmem>>, vector<1x1x32x128xbf16>
    %110 = vector.shape_cast %109 : vector<1x1x32x128xbf16> to vector<32x128xbf16>
    %cst_41 = arith.constant dense<0.000000e+00> : vector<16x128xf32>
    %111 = tpu.matmul %108, %110, %cst_41 {dimension_numbers = #tpu.dot_dimension_numbers<[1], [0], [0], [1], [0, 0, 1, 1], [], []>} : vector<16x32xbf16>, vector<32x128xbf16>, vector<16x128xf32> -> vector<16x128xf32>
    %112 = arith.addf %87, %111 : vector<16x128xf32>
    %c0_42 = arith.constant 0 : index
    %c0_43 = arith.constant 0 : index
    %c0_44 = arith.constant 0 : index
    %113 = vector.load %arg6[%c0_42, %c0_43, %c0_44] : memref<1x1x128xf32, #tpu.memory_space<vmem>>, vector<1x1x128xf32>
    %114 = vector.shape_cast %113 : vector<1x1x128xf32> to vector<1x128xf32>
    %115 = vector.broadcast %114 : vector<1x128xf32> to vector<16x128xf32>
    %116 = arith.addf %112, %115 : vector<16x128xf32>
    %117 = arith.addf %4, %116 : vector<16x128xf32>
    %c0_45 = arith.constant 0 : index
    %c0_46 = arith.constant 0 : index
    %c0_47 = arith.constant 0 : index
    %118 = vector.load %arg11[%c0_45, %c0_46, %c0_47] : memref<1x1x128xf32, #tpu.memory_space<vmem>>, vector<1x1x128xf32>
    %119 = vector.shape_cast %118 : vector<1x1x128xf32> to vector<1x128xf32>
    %c0_48 = arith.constant 0 : index
    %c0_49 = arith.constant 0 : index
    %c0_50 = arith.constant 0 : index
    %120 = vector.load %arg12[%c0_48, %c0_49, %c0_50] : memref<1x1x128xf32, #tpu.memory_space<vmem>>, vector<1x1x128xf32>
    %121 = vector.shape_cast %120 : vector<1x1x128xf32> to vector<1x128xf32>
    %cst_51 = arith.constant dense<0.000000e+00> : vector<16xf32>
    %122 = vector.multi_reduction <add>, %117, %cst_51 [1] : vector<16x128xf32> to vector<16xf32>
    %123 = vector.shape_cast %122 : vector<16xf32> to vector<16x1xf32>
    %cst_52 = arith.constant 1.280000e+02 : f32
    %124 = vector.broadcast %cst_52 : f32 to vector<16x1xf32>
    %125 = arith.divf %123, %124 : vector<16x1xf32>
    %126 = vector.broadcast %125 : vector<16x1xf32> to vector<16x128xf32>
    %127 = arith.subf %117, %126 : vector<16x128xf32>
    %128 = arith.mulf %127, %127 : vector<16x128xf32>
    %cst_53 = arith.constant dense<0.000000e+00> : vector<16xf32>
    %129 = vector.multi_reduction <add>, %128, %cst_53 [1] : vector<16x128xf32> to vector<16xf32>
    %130 = vector.shape_cast %129 : vector<16xf32> to vector<16x1xf32>
    %cst_54 = arith.constant 1.280000e+02 : f32
    %131 = vector.broadcast %cst_54 : f32 to vector<16x1xf32>
    %132 = arith.divf %130, %131 : vector<16x1xf32>
    %133 = vector.broadcast %125 : vector<16x1xf32> to vector<16x128xf32>
    %134 = arith.subf %117, %133 : vector<16x128xf32>
    %cst_55 = arith.constant 9.99999974E-6 : f32
    %135 = vector.broadcast %cst_55 : f32 to vector<16x1xf32>
    %136 = arith.addf %132, %135 : vector<16x1xf32>
    %137 = math.rsqrt %136 : vector<16x1xf32>
    %138 = vector.broadcast %137 : vector<16x1xf32> to vector<16x128xf32>
    %139 = arith.mulf %134, %138 : vector<16x128xf32>
    %140 = vector.broadcast %119 : vector<1x128xf32> to vector<16x128xf32>
    %141 = arith.mulf %139, %140 : vector<16x128xf32>
    %142 = vector.broadcast %121 : vector<1x128xf32> to vector<16x128xf32>
    %143 = arith.addf %141, %142 : vector<16x128xf32>
    %144 = arith.truncf %143 : vector<16x128xf32> to vector<16x128xbf16>
    %c0_56 = arith.constant 0 : index
    %c0_57 = arith.constant 0 : index
    %c0_58 = arith.constant 0 : index
    %145 = vector.load %arg7[%c0_56, %c0_57, %c0_58] : memref<1x128x256xbf16, #tpu.memory_space<vmem>>, vector<1x128x256xbf16>
    %146 = vector.shape_cast %145 : vector<1x128x256xbf16> to vector<128x256xbf16>
    %cst_59 = arith.constant dense<0.000000e+00> : vector<16x256xf32>
    %147 = tpu.matmul %144, %146, %cst_59 {dimension_numbers = #tpu.dot_dimension_numbers<[1], [0], [0], [1], [0, 0, 1, 1], [], []>} : vector<16x128xbf16>, vector<128x256xbf16>, vector<16x256xf32> -> vector<16x256xf32>
    %c0_60 = arith.constant 0 : index
    %c0_61 = arith.constant 0 : index
    %c0_62 = arith.constant 0 : index
    %148 = vector.load %arg8[%c0_60, %c0_61, %c0_62] : memref<1x1x256xf32, #tpu.memory_space<vmem>>, vector<1x1x256xf32>
    %149 = vector.shape_cast %148 : vector<1x1x256xf32> to vector<1x256xf32>
    %150 = vector.broadcast %149 : vector<1x256xf32> to vector<16x256xf32>
    %151 = arith.addf %147, %150 : vector<16x256xf32>
    %cst_63 = arith.constant 0.000000e+00 : f32
    %152 = vector.broadcast %cst_63 : f32 to vector<16x256xf32>
    %153 = arith.maximumf %151, %152 : vector<16x256xf32>
    %154 = arith.truncf %153 : vector<16x256xf32> to vector<16x256xbf16>
    %c0_64 = arith.constant 0 : index
    %c0_65 = arith.constant 0 : index
    %c0_66 = arith.constant 0 : index
    %155 = vector.load %arg9[%c0_64, %c0_65, %c0_66] : memref<1x256x128xbf16, #tpu.memory_space<vmem>>, vector<1x256x128xbf16>
    %156 = vector.shape_cast %155 : vector<1x256x128xbf16> to vector<256x128xbf16>
    %cst_67 = arith.constant dense<0.000000e+00> : vector<16x128xf32>
    %157 = tpu.matmul %154, %156, %cst_67 {dimension_numbers = #tpu.dot_dimension_numbers<[1], [0], [0], [1], [0, 0, 1, 1], [], []>} : vector<16x256xbf16>, vector<256x128xbf16>, vector<16x128xf32> -> vector<16x128xf32>
    %c0_68 = arith.constant 0 : index
    %c0_69 = arith.constant 0 : index
    %c0_70 = arith.constant 0 : index
    %158 = vector.load %arg10[%c0_68, %c0_69, %c0_70] : memref<1x1x128xf32, #tpu.memory_space<vmem>>, vector<1x1x128xf32>
    %159 = vector.shape_cast %158 : vector<1x1x128xf32> to vector<1x128xf32>
    %160 = vector.broadcast %159 : vector<1x128xf32> to vector<16x128xf32>
    %161 = arith.addf %157, %160 : vector<16x128xf32>
    %162 = arith.addf %143, %161 : vector<16x128xf32>
    %c0_71 = arith.constant 0 : index
    %c0_72 = arith.constant 0 : index
    %c0_73 = arith.constant 0 : index
    %163 = vector.load %arg13[%c0_71, %c0_72, %c0_73] : memref<1x1x128xf32, #tpu.memory_space<vmem>>, vector<1x1x128xf32>
    %164 = vector.shape_cast %163 : vector<1x1x128xf32> to vector<1x128xf32>
    %c0_74 = arith.constant 0 : index
    %c0_75 = arith.constant 0 : index
    %c0_76 = arith.constant 0 : index
    %165 = vector.load %arg14[%c0_74, %c0_75, %c0_76] : memref<1x1x128xf32, #tpu.memory_space<vmem>>, vector<1x1x128xf32>
    %166 = vector.shape_cast %165 : vector<1x1x128xf32> to vector<1x128xf32>
    %cst_77 = arith.constant dense<0.000000e+00> : vector<16xf32>
    %167 = vector.multi_reduction <add>, %162, %cst_77 [1] : vector<16x128xf32> to vector<16xf32>
    %168 = vector.shape_cast %167 : vector<16xf32> to vector<16x1xf32>
    %cst_78 = arith.constant 1.280000e+02 : f32
    %169 = vector.broadcast %cst_78 : f32 to vector<16x1xf32>
    %170 = arith.divf %168, %169 : vector<16x1xf32>
    %171 = vector.broadcast %170 : vector<16x1xf32> to vector<16x128xf32>
    %172 = arith.subf %162, %171 : vector<16x128xf32>
    %173 = arith.mulf %172, %172 : vector<16x128xf32>
    %cst_79 = arith.constant dense<0.000000e+00> : vector<16xf32>
    %174 = vector.multi_reduction <add>, %173, %cst_79 [1] : vector<16x128xf32> to vector<16xf32>
    %175 = vector.shape_cast %174 : vector<16xf32> to vector<16x1xf32>
    %cst_80 = arith.constant 1.280000e+02 : f32
    %176 = vector.broadcast %cst_80 : f32 to vector<16x1xf32>
    %177 = arith.divf %175, %176 : vector<16x1xf32>
    %178 = vector.broadcast %170 : vector<16x1xf32> to vector<16x128xf32>
    %179 = arith.subf %162, %178 : vector<16x128xf32>
    %cst_81 = arith.constant 9.99999974E-6 : f32
    %180 = vector.broadcast %cst_81 : f32 to vector<16x1xf32>
    %181 = arith.addf %177, %180 : vector<16x1xf32>
    %182 = math.rsqrt %181 : vector<16x1xf32>
    %183 = vector.broadcast %182 : vector<16x1xf32> to vector<16x128xf32>
    %184 = arith.mulf %179, %183 : vector<16x128xf32>
    %185 = vector.broadcast %164 : vector<1x128xf32> to vector<16x128xf32>
    %186 = arith.mulf %184, %185 : vector<16x128xf32>
    %187 = vector.broadcast %166 : vector<1x128xf32> to vector<16x128xf32>
    %188 = arith.addf %186, %187 : vector<16x128xf32>
    %c1_i32 = arith.constant 1 : i32
    %189 = arith.cmpi slt, %arg1, %c1_i32 : i32
    %190 = arith.extui %189 : i1 to i32
    %c0_i32_82 = arith.constant 0 : i32
    %191 = arith.cmpi ne, %190, %c0_i32_82 : i32
    scf.if %191 {
      %195 = vector.shape_cast %188 : vector<16x128xf32> to vector<2x8x128xf32>
      %c0_85 = arith.constant 0 : index
      %c0_86 = arith.constant 0 : index
      %c0_87 = arith.constant 0 : index
      %196 = vector.load %arg18[%c0_85, %c0_86, %c0_87] : memref<2x8x128xf32, #tpu.memory_space<vmem>>, vector<2x8x128xf32>
      tpu.vector_store %arg18[%c0_85, %c0_86, %c0_87], %195 {strides = array<i32>} : memref<2x8x128xf32, #tpu.memory_space<vmem>>, vector<2x8x128xf32>,
    } else {
    }
    %c1_i32_83 = arith.constant 1 : i32
    %192 = arith.cmpi eq, %arg1, %c1_i32_83 : i32
    %193 = arith.extui %192 : i1 to i32
    %c0_i32_84 = arith.constant 0 : i32
    %194 = arith.cmpi ne, %193, %c0_i32_84 : i32
    scf.if %194 {
      %c0_85 = arith.constant 0 : index
      %c0_86 = arith.constant 0 : index
      %195 = vector.load %arg15[%c0_85, %c0_86] : memref<1x128xf32, #tpu.memory_space<vmem>>, vector<1x128xf32>
      %c0_87 = arith.constant 0 : index
      %c0_88 = arith.constant 0 : index
      %196 = vector.load %arg16[%c0_87, %c0_88] : memref<1x128xf32, #tpu.memory_space<vmem>>, vector<1x128xf32>
      %cst_89 = arith.constant dense<0.000000e+00> : vector<16xf32>
      %197 = vector.multi_reduction <add>, %188, %cst_89 [1] : vector<16x128xf32> to vector<16xf32>
      %198 = vector.shape_cast %197 : vector<16xf32> to vector<16x1xf32>
      %cst_90 = arith.constant 1.280000e+02 : f32
      %199 = vector.broadcast %cst_90 : f32 to vector<16x1xf32>
      %200 = arith.divf %198, %199 : vector<16x1xf32>
      %201 = vector.broadcast %200 : vector<16x1xf32> to vector<16x128xf32>
      %202 = arith.subf %188, %201 : vector<16x128xf32>
      %203 = arith.mulf %202, %202 : vector<16x128xf32>
      %cst_91 = arith.constant dense<0.000000e+00> : vector<16xf32>
      %204 = vector.multi_reduction <add>, %203, %cst_91 [1] : vector<16x128xf32> to vector<16xf32>
      %205 = vector.shape_cast %204 : vector<16xf32> to vector<16x1xf32>
      %cst_92 = arith.constant 1.280000e+02 : f32
      %206 = vector.broadcast %cst_92 : f32 to vector<16x1xf32>
      %207 = arith.divf %205, %206 : vector<16x1xf32>
      %208 = vector.broadcast %200 : vector<16x1xf32> to vector<16x128xf32>
      %209 = arith.subf %188, %208 : vector<16x128xf32>
      %cst_93 = arith.constant 9.99999974E-6 : f32
      %210 = vector.broadcast %cst_93 : f32 to vector<16x1xf32>
      %211 = arith.addf %207, %210 : vector<16x1xf32>
      %212 = math.rsqrt %211 : vector<16x1xf32>
      %213 = vector.broadcast %212 : vector<16x1xf32> to vector<16x128xf32>
      %214 = arith.mulf %209, %213 : vector<16x128xf32>
      %215 = vector.broadcast %195 : vector<1x128xf32> to vector<16x128xf32>
      %216 = arith.mulf %214, %215 : vector<16x128xf32>
      %217 = vector.broadcast %196 : vector<1x128xf32> to vector<16x128xf32>
      %218 = arith.addf %216, %217 : vector<16x128xf32>
      %219 = vector.shape_cast %218 : vector<16x128xf32> to vector<2x8x128xf32>
      %c0_94 = arith.constant 0 : index
      %c0_95 = arith.constant 0 : index
      %c0_96 = arith.constant 0 : index
      %220 = vector.load %arg17[%c0_94, %c0_95, %c0_96] : memref<2x8x128xf32, #tpu.memory_space<vmem>>, vector<2x8x128xf32>
      tpu.vector_store %arg17[%c0_94, %c0_95, %c0_96], %219 {strides = array<i32>} : memref<2x8x128xf32, #tpu.memory_space<vmem>>, vector<2x8x128xf32>,
    } else {
    }
    return
  }
  func.func @transform_0(%arg0: i32, %arg1: i32) -> (i32, i32, i32) {
    %c0_i32 = arith.constant 0 : i32
    %c0_i32_0 = arith.constant 0 : i32
    %c0_i32_1 = arith.constant 0 : i32
    return %arg0, %c0_i32, %c0_i32_0 : i32, i32, i32
  }
  func.func @transform_1(%arg0: i32, %arg1: i32) -> (i32, i32, i32) {
    %c0_i32 = arith.constant 0 : i32
    %c0_i32_0 = arith.constant 0 : i32
    %c0_i32_1 = arith.constant 0 : i32
    return %arg1, %c0_i32, %c0_i32_0 : i32, i32, i32
  }
  func.func @transform_2(%arg0: i32, %arg1: i32) -> (i32, i32, i32) {
    %c0_i32 = arith.constant 0 : i32
    %c0_i32_0 = arith.constant 0 : i32
    %c0_i32_1 = arith.constant 0 : i32
    return %arg1, %c0_i32, %c0_i32_0 : i32, i32, i32
  }
  func.func @transform_3(%arg0: i32, %arg1: i32) -> (i32, i32, i32, i32) {
    %c0_i32 = arith.constant 0 : i32
    %c0_i32_0 = arith.constant 0 : i32
    %c0_i32_1 = arith.constant 0 : i32
    %c0_i32_2 = arith.constant 0 : i32
    return %arg1, %c0_i32, %c0_i32_0, %c0_i32_1 : i32, i32, i32, i32
  }
  func.func @transform_4(%arg0: i32, %arg1: i32) -> (i32, i32, i32) {
    %c0_i32 = arith.constant 0 : i32
    %c0_i32_0 = arith.constant 0 : i32
    %c0_i32_1 = arith.constant 0 : i32
    return %arg1, %c0_i32, %c0_i32_0 : i32, i32, i32
  }
  func.func @transform_5(%arg0: i32, %arg1: i32) -> (i32, i32, i32) {
    %c0_i32 = arith.constant 0 : i32
    %c0_i32_0 = arith.constant 0 : i32
    %c0_i32_1 = arith.constant 0 : i32
    return %arg1, %c0_i32, %c0_i32_0 : i32, i32, i32
  }
  func.func @transform_6(%arg0: i32, %arg1: i32) -> (i32, i32, i32) {
    %c0_i32 = arith.constant 0 : i32
    %c0_i32_0 = arith.constant 0 : i32
    %c0_i32_1 = arith.constant 0 : i32
    return %arg1, %c0_i32, %c0_i32_0 : i32, i32, i32
  }
  func.func @transform_7(%arg0: i32, %arg1: i32) -> (i32, i32, i32) {
    %c0_i32 = arith.constant 0 : i32
    %c0_i32_0 = arith.constant 0 : i32
    %c0_i32_1 = arith.constant 0 : i32
    return %arg1, %c0_i32, %c0_i32_0 : i32, i32, i32
  }
  func.func @transform_8(%arg0: i32, %arg1: i32) -> (i32, i32, i32) {
    %c0_i32 = arith.constant 0 : i32
    %c0_i32_0 = arith.constant 0 : i32
    %c0_i32_1 = arith.constant 0 : i32
    return %arg1, %c0_i32, %c0_i32_0 : i32, i32, i32
  }
  func.func @transform_9(%arg0: i32, %arg1: i32) -> (i32, i32, i32) {
    %c0_i32 = arith.constant 0 : i32
    %c0_i32_0 = arith.constant 0 : i32
    %c0_i32_1 = arith.constant 0 : i32
    return %arg1, %c0_i32, %c0_i32_0 : i32, i32, i32
  }
  func.func @transform_10(%arg0: i32, %arg1: i32) -> (i32, i32, i32) {
    %c0_i32 = arith.constant 0 : i32
    %c0_i32_0 = arith.constant 0 : i32
    %c0_i32_1 = arith.constant 0 : i32
    return %arg1, %c0_i32, %c0_i32_0 : i32, i32, i32
  }
  func.func @transform_11(%arg0: i32, %arg1: i32) -> (i32, i32, i32) {
    %c0_i32 = arith.constant 0 : i32
    %c0_i32_0 = arith.constant 0 : i32
    %c0_i32_1 = arith.constant 0 : i32
    return %arg1, %c0_i32, %c0_i32_0 : i32, i32, i32
  }
  func.func @transform_12(%arg0: i32, %arg1: i32) -> (i32, i32, i32) {
    %c0_i32 = arith.constant 0 : i32
    %c0_i32_0 = arith.constant 0 : i32
    %c0_i32_1 = arith.constant 0 : i32
    return %arg1, %c0_i32, %c0_i32_0 : i32, i32, i32
  }
  func.func @transform_13(%arg0: i32, %arg1: i32) -> (i32, i32) {
    %c0_i32 = arith.constant 0 : i32
    %c0_i32_0 = arith.constant 0 : i32
    %c0_i32_1 = arith.constant 0 : i32
    return %c0_i32, %c0_i32_0 : i32, i32
  }
  func.func @transform_14(%arg0: i32, %arg1: i32) -> (i32, i32) {
    %c0_i32 = arith.constant 0 : i32
    %c0_i32_0 = arith.constant 0 : i32
    %c0_i32_1 = arith.constant 0 : i32
    return %c0_i32, %c0_i32_0 : i32, i32
  }
  func.func @transform_15(%arg0: i32, %arg1: i32) -> (i32, i32, i32) {
    %c0_i32 = arith.constant 0 : i32
    %c0_i32_0 = arith.constant 0 : i32
    %c0_i32_1 = arith.constant 0 : i32
    return %arg0, %c0_i32, %c0_i32_0 : i32, i32, i32
  }
}

</mosaic_0001>

<bundles_post_ra>
// kernel: transformer_encoder_forward.1
= control target key start
LH: loop header
LB: loop body
LE: loop exit
PB: predicated region body
PF: predicated region fallthrough
CT: control target
= control target key end

     0   :  { %s5431_s0 = inlined_call_operand.hbm [shape: f32[2,8,128], index: 0, kind: input, shape index: {}]   ;;  %s5432_s1 = inlined_call_operand.hbm [shape: bf16[2,128,384], index: 1, kind: input, shape index: {}]   ;;  %s5433_s2 = inlined_call_operand.hbm [shape: f32[2,1,384], index: 2, kind: input, shape index: {}]   ;;  %s5434_s3 = inlined_call_operand.hbm [shape: bf16[2,4,32,128], index: 3, kind: input, shape index: {}]   ;;  %s5435_s4 = inlined_call_operand.hbm [shape: f32[2,1,128], index: 4, kind: input, shape index: {}]   ;;  %s5436_s5 = inlined_call_operand.hbm [shape: bf16[2,128,256], index: 5, kind: input, shape index: {}]   ;;  %s5437_s6 = inlined_call_operand.hbm [shape: f32[2,1,256], index: 6, kind: input, shape index: {}]   ;;  %s5438_s7 = inlined_call_operand.hbm [shape: bf16[2,256,128], index: 7, kind: input, shape index: {}]   ;;  %s5439_s8 = inlined_call_operand.hbm [shape: f32[2,1,128], index: 8, kind: input, shape index: {}]   ;;  %s5440_s9 = inlined_call_operand.hbm [shape: f32[2,1,128], index: 9, kind: input, shape index: {}]   ;;  %s5441_s10 = inlined_call_operand.hbm [shape: f32[2,1,128], index: 10, kind: input, shape index: {}]   ;;  %s5442_s11 = inlined_call_operand.hbm [shape: f32[2,1,128], index: 11, kind: input, shape index: {}]   ;;  %s5443_s12 = inlined_call_operand.hbm [shape: f32[2,1,128], index: 12, kind: input, shape index: {}]   ;;  %s5444_s13 = inlined_call_operand.hbm [shape: f32[1,128], index: 13, kind: input, shape index: {}]   ;;  %s5445_s14 = inlined_call_operand.hbm [shape: f32[1,128], index: 14, kind: input, shape index: {}]   ;;  %s5446_s15 = inlined_call_operand.hbm [shape: f32[2,8,128], index: 15, kind: output, shape index: {}]  }
   0x1   :  { %5481 = sst [smem:[#allocation46_spill]] %s5432_s1 }
   0x2   :  { %5482 = sst [smem:[#allocation47_spill]] %s5434_s3 }
   0x3   :  { %5483 = sst [smem:[#allocation48_spill]] %s5439_s8 }
   0x4   :  { %5484 = sst [smem:[#allocation49_spill]] %s5441_s10 }
   0x5   :  { %5485 = sst [smem:[#allocation50_spill]] %s5443_s12 }
   0x6   :  { %5486 = sst [smem:[#allocation51_spill]] %s5444_s13 }
   0x7   :  { %5487 = sst [smem:[#allocation52_spill]] %s5446_s15 }
   0x8   :  { %20 = vsyncpa [#allocation4], 0 }
   0x9   :  { %21 = vsyncpa [#allocation7], 0 }
   0xa   :  { %23 = vsyncpa [#allocation7 + $0x1], 0 }
   0xb   :  { %24 = vsyncpa [#allocation10], 0 }
   0xc   :  { %26 = vsyncpa [#allocation10 + $0x1], 0 }
   0xd   :  { %27 = vsyncpa [#allocation13], 0 }
   0xe   :  { %29 = vsyncpa [#allocation13 + $0x1], 0 }
   0xf   :  { %30 = vsyncpa [#allocation16], 0 }
  0x10   :  { %32 = vsyncpa [#allocation16 + $0x1], 0 }
  0x11   :  { %33 = vsyncpa [#allocation19], 0 }
  0x12   :  { %35 = vsyncpa [#allocation19 + $0x1], 0 }
  0x13   :  { %36 = vsyncpa [#allocation22], 0 }
  0x14   :  { %38 = vsyncpa [#allocation22 + $0x1], 0 }
  0x15   :  { %39 = vsyncpa [#allocation25], 0 }
  0x16   :  { %40 = vsyncpa [#allocation5], 0  ;;  %s4506_s18 = smov 0   ;;  %s4508_s19 = smov 0  }
  0x17   :  { %s4510_s20 = smov 0   ;;  %s4512_s21 = smov 0  }
  0x18   :  { %s4514_s22 = smov 0   ;;  %s4516_s23 = smov 0  }
  0x19 LB: > { %5488 = sst [smem:[#allocation37_spill]] %s4378_s19  ;;  %s4535_s24 = sadd.s32 4294967295, %s4394_s23   ;;  %s4394_s23 = sphi %s4516_s23, %s46_s23   ;;  %s4390_s22 = sphi %s4514_s22, %s5556_s22   ;;  %s4386_s21 = sphi %s4512_s21, %s5555_s21   ;;  %s4382_s20 = sphi %s4510_s20, %s5553_s20   ;;  %s4378_s19 = sphi %s4508_s19, %s5552_s19   ;;  %s4374_s18 = sphi %s4506_s18, %s5551_s18  }
  0x1a   : > { %5489 = sst [smem:[#allocation38_spill]] %s4382_s20  ;;  %s55_s25 = sadd.s32 1, %s4390_s22 }
  0x1b   : > { %5490 = sst [smem:[#allocation39_spill]] %s4386_s21  ;;  %p56_p0 = scmp.ge.s32.totalorder %s55_s25, 2 }
  0x1c   : > { %5491 = sst [smem:[#allocation40_spill]] %s4394_s23  ;;  %s91_s26 = sadd.s32 1, %s4382_s20 }
  0x1d   : > { %5492 = sst [smem:[#allocation41_spill]] %s4535_s24  ;;  %p98_p1 = scmp.ne.s32.totalorder %s4382_s20, %s4378_s19 }
  0x1e   : > { %p99_p2 = scmp.eq.s32.totalorder %s4394_s23, 0  ;;  %s5558_s25 = smov (%p56_p0, %s55_s25), 0 }
  0x1f   : > { %5493 = sst [smem:[#allocation42_spill]] %s5558_s25  ;;  %p104_p4 = scmp.ne.s32.totalorder %s4378_s19, %s4374_s18 }
  0x20   : > { %p4544_p3 = por %p99_p2, %p98_p1  ;;  %s88_s28 = ssub.s32 %s4390_s22, %s5558_s25 }
  0x21   : > { %p5456_p5 = scmp.eq.s32.totalorder %s4535_s24, 0  ;;  %p89_p6 = scmp.eq.s32.totalorder %s88_s28, 0 }
  0x22   : > { %p3167_p7 = scmp.ge.s32.totalorder %s4394_s23, 1  ;;  %p469_p9 = scmp.lt.s32.totalorder %s4394_s23, 3 }
  0x23   : > { %p4555_p8 = por %p5456_p5, %p104_p4  ;;  %s4396_s17 = smov [#allocation24]  }
  0x24   : > { %s4561_s30 = scalar_select %p89_p6, %s4382_s20, %s91_s26  }
  0x25   : > { %s5495_s29 = scalar_select %p4555_p8, 1, 0 }
  0x26   : > { %5497 = sst [smem:[#allocation44_spill]] %s4561_s30  ;;  %p4563_p10 = pnand %p3167_p7, %p469_p9 }
  0x27   : > { %5496 = sst [smem:[#allocation43_spill]] %s5495_s29  ;;  %s498_s18 = sshll.u32 %s4396_s17, 4  ;;  %s499_s18 = int_to_ptr.vmem [resolvable:$true] %s498_s18 }
  0x28   : > { %s5498_s16 = scalar_select %p4563_p10, 1, 0 }
  0x29   : > { %p3596_p11 = pneg %p4563_p10  ;;  %p3646_p12 = scmp.lt.s32.totalorder %s4394_s23, 2 }
  0x2a   : > { %5499 = sst [smem:[#allocation45_spill]] %s5498_s16  ;;  %s4577_s25 = sand.u32 1, %s4382_s20  }
  0x2b   : > { %p4572_p13 = pnand %p3596_p11, %p5456_p5  ;;  %p4581_p0 = pnand %p3646_p12, %p4544_p3 }
  0x2c   : > { %s4586_s30 = sand.u32 1, %s4394_s23   ;;  %s5502_s13 = sld [smem:[#allocation51_spill]] }
  0x2d   : > { %s5500_s28 = scalar_select %p4572_p13, 1, 0 }
  0x2e   : > { %s5501_s26 = scalar_select %p4581_p0, 1, 0 }
  0x2f   : > { %p4596_p2 = pneg %p4572_p13 }
  0x31   : > { %s5503_s24 = scalar_select %p4596_p2, 1, 0 }
  0x32   : > { %s3842_s17 = scalar_lea.hbm %s5502_s13, 16 }
  0x33   : > { %p3843_p1 = scmp.ne.s32.totalorder %s5502_s13, %s3842_s17  ;;  %p3849_p6 = scmp.lt.u32.totalorder %s3842_s17, %s5502_s13 }
  0x35   : > { %p3845_p3 = pnand %p4596_p2, %p3843_p1 }
  0x37   : > { %p3846_p4 = pneg %p3845_p3 }
  0x39   : > { %p3851_p7 = pnand %p3849_p6, %p3846_p4 }
  0x3b   : > { %3854 = shalt.err (!%p3851_p7)
}
  0x3c   : > { %s3855_s15 = scalar_lea.vmem %s499_s18, 16  ;;  %s3862_s19 = scalar_lea.vmem %s499_s18, 32 }
  0x3d   : > { %p3856_p9 = scmp.ne.s32.totalorder %s499_s18, %s3855_s15  ;;  %p3863_p5 = scmp.lt.s32.totalorder %s499_s18, %s499_s18 }
  0x3e   : > { %p3864_p8 = scmp.lt.s32.totalorder %s3862_s19, %s3855_s15 }
  0x3f   : > { %p3858_p11 = pnand %p3856_p9, %p4596_p2 }
  0x40   : > { %p3865_p10 = por %p3864_p8, %p3863_p5 }
  0x41   : > { %p3859_p12 = pneg %p3858_p11 }
  0x43   : > { %p3866_p0 = pnand %p3865_p10, %p3859_p12 }
  0x45   : > { %3869 = shalt.err (!%p3866_p0)
}
  0x46   : > { %3602 = dma.hbm_to_vmem [thread:$0]  (!%p4572_p13), %s5502_s13, 16, %s499_s18, [#allocation25]  }
  0x47   : > { %s3550_s20 = smul.u32 192, %s4577_s25  ;;  %s5504_s1 = sld [smem:[#allocation46_spill]] }
  0x48   : > { %s3551_s17 = smul.u32 3072, %s4390_s22  ;;  %p5505_p8 = scmp.ne.s32.totalorder %s5501_s26, 0 }
  0x49   : > { %s524_s15 = scalar_lea.vmem [#allocation6], %s3550_s20 }
  0x4a   : > { %s531_s19 = sshll.u32 %s524_s15, 4  ;;  %p4626_p10 = pneg %p5505_p8  ;;  %s4619_s19 = int_to_ptr.vmem [resolvable:$true] %s531_s19 }
  0x4c   : > { %s5506_s18 = scalar_select %p4626_p10, 1, 0 }
  0x4d   : > { %s4617_s16 = scalar_lea.hbm %s5504_s1, %s3551_s17  ;;  %s3875_s27 = scalar_lea.hbm %s5504_s1, 6144 }
  0x4e   : > { %s3870_s29 = scalar_lea.hbm %s4617_s16, 3072  ;;  %p3876_p3 = scmp.lt.u32.totalorder %s4617_s16, %s5504_s1 }
  0x4f   : > { %p3871_p5 = scmp.ne.s32.totalorder %s4617_s16, %s3870_s29  ;;  %p3877_p4 = scmp.lt.u32.totalorder %s3875_s27, %s3870_s29 }
  0x50   : > { %p3879_p7 = scmp.lt.u32.totalorder %s3870_s29, %s4617_s16 }
  0x51   : > { %p3873_p0 = pnand %p4626_p10, %p3871_p5  ;;  %p3878_p6 = por %p3877_p4, %p3876_p3 }
  0x53   : > { %p3874_p1 = pneg %p3873_p0  ;;  %p3880_p9 = por %p3879_p7, %p3878_p6 }
  0x55   : > { %p3881_p11 = pnand %p3880_p9, %p3874_p1 }
  0x57   : > { %3884 = shalt.err (!%p3881_p11)
}
  0x58   : > { %s3885_s21 = scalar_lea.vmem %s4619_s19, 3072  ;;  %s4397_s23 = smov [#allocation6]  }
  0x59   : > { %p3886_p12 = scmp.ne.s32.totalorder %s4619_s19, %s3885_s21  ;;  %s3890_s17 = sshll.u32 %s4397_s23, 4  ;;  %s3891_s17 = int_to_ptr.vmem [resolvable:$false] %s3890_s17 }
  0x5a   : > { %s3892_s20 = scalar_lea.vmem %s3891_s17, 6144  ;;  %p3893_p13 = scmp.lt.s32.totalorder %s4619_s19, %s3891_s17 }
  0x5b   : > { %p3888_p5 = pnand %p3886_p12, %p4626_p10  ;;  %p3894_p2 = scmp.lt.s32.totalorder %s3892_s20, %s3885_s21 }
  0x5d   : > { %p3889_p0 = pneg %p3888_p5  ;;  %p3895_p3 = por %p3894_p2, %p3893_p13 }
  0x5f   : > { %p3896_p4 = pnand %p3895_p3, %p3889_p0 }
  0x61   : > { %3899 = shalt.err (!%p3896_p4)
}
  0x62   : > { %s4398_s29 = smov 192   ;;  %s4399_s27 = smov 12  }
  0x63   : > { %s5507_s15 = scalar_lea.sflag [#allocation7], %s4586_s30  ;;  %s3174_s23 = sshll.u32 %s4577_s25, 6 }
  0x64   : > { %3609 = dma.hbm_to_vmem [thread:$0]  (!%p5505_p8), %s4617_s16, 3072, %s4619_s19, %s5507_s15, %s4398_s29, %s4398_s29, %s4399_s27  }
  0x65   : > { %s3317_s1 = sshll.u32 %s4390_s22, 10  ;;  %s5508_s3 = sld [smem:[#allocation47_spill]] }
  0x66   : > { %s564_s13 = scalar_lea.vmem [#allocation9], %s3174_s23  ;;  %s5469_s10 = scalar_lea.sflag [#allocation10], %s4586_s30 }
  0x67   : > { %s571_s12 = sshll.u32 %s564_s13, 4  ;;  %s4658_s12 = int_to_ptr.vmem [resolvable:$true] %s571_s12 }
  0x6b   : > { %s4656_s20 = scalar_lea.hbm %s5508_s3, %s3317_s1  ;;  %s3905_s29 = scalar_lea.hbm %s5508_s3, 2048 }
  0x6c   : > { %s3900_s8 = scalar_lea.hbm %s4656_s20, 1024  ;;  %p3906_p6 = scmp.lt.u32.totalorder %s4656_s20, %s5508_s3 }
  0x6d   : > { %p3901_p13 = scmp.ne.s32.totalorder %s4656_s20, %s3900_s8  ;;  %p3907_p7 = scmp.lt.u32.totalorder %s3905_s29, %s3900_s8 }
  0x6e   : > { %p3909_p11 = scmp.lt.u32.totalorder %s3900_s8, %s4656_s20 }
  0x6f   : > { %p3903_p2 = pnand %p3901_p13, %p4626_p10  ;;  %p3908_p9 = por %p3907_p7, %p3906_p6 }
  0x71   : > { %p3904_p1 = pneg %p3903_p2  ;;  %p3910_p12 = por %p3909_p11, %p3908_p9 }
  0x73   : > { %p3911_p5 = pnand %p3910_p12, %p3904_p1 }
  0x75   : > { %3914 = shalt.err (!%p3911_p5)
}
  0x76   : > { %s3915_s13 = scalar_lea.vmem %s4658_s12, 1024  ;;  %s4400_s15 = smov [#allocation9]  }
  0x77   : > { %p3916_p0 = scmp.ne.s32.totalorder %s4658_s12, %s3915_s13  ;;  %s3920_s23 = sshll.u32 %s4400_s15, 4  ;;  %s3921_s23 = int_to_ptr.vmem [resolvable:$false] %s3920_s23 }
  0x78   : > { %s3922_s17 = scalar_lea.vmem %s3921_s23, 2048  ;;  %p3923_p13 = scmp.lt.s32.totalorder %s4658_s12, %s3921_s23 }
  0x79   : > { %p3918_p3 = pnand %p3916_p0, %p4626_p10  ;;  %p3924_p2 = scmp.lt.s32.totalorder %s3922_s17, %s3915_s13 }
  0x7b   : > { %p3919_p4 = pneg %p3918_p3  ;;  %p3925_p6 = por %p3924_p2, %p3923_p13 }
  0x7d   : > { %p3926_p7 = pnand %p3925_p6, %p3919_p4 }
  0x7f   : > { %3929 = shalt.err (!%p3926_p7)
}
  0x80   : > { %s5470_s8 = smov 64   ;;  %s5471_s21 = smov 4  }
  0x81   : > { %3615 = dma.hbm_to_vmem [thread:$0]  (!%p5505_p8), %s4656_s20, 1024, %s4658_s12, %s5469_s10, %s5470_s8, %s5470_s8, %s5471_s21  }
  0x82   : > { %s3178_s16 = sshll.u32 %s4577_s25, 7  ;;  %s3318_s19 = sshll.u32 %s4390_s22, 11 }
  0x83   : > { %s4694_s27 = scalar_lea.hbm %s5436_s5, %s3318_s19  ;;  %s602_s13 = scalar_lea.vmem [#allocation12], %s3178_s16 }
  0x84   : > { %s609_s15 = sshll.u32 %s602_s13, 4  ;;  %s5472_s23 = scalar_lea.sflag [#allocation13], %s4586_s30  ;;  %s4698_s15 = int_to_ptr.vmem [resolvable:$true] %s609_s15 }
  0x85   : > { %s3930_s17 = scalar_lea.hbm %s4694_s27, 2048  ;;  %s3935_s29 = scalar_lea.hbm %s5436_s5, 4096 }
  0x86   : > { %p3931_p1 = scmp.ne.s32.totalorder %s4694_s27, %s3930_s17  ;;  %p3936_p12 = scmp.lt.u32.totalorder %s4694_s27, %s5436_s5 }
  0x87   : > { %p3937_p5 = scmp.lt.u32.totalorder %s3935_s29, %s3930_s17  ;;  %p3939_p3 = scmp.lt.u32.totalorder %s3930_s17, %s4694_s27 }
  0x88   : > { %p3933_p9 = pnand %p3931_p1, %p4626_p10 }
  0x89   : > { %p3938_p0 = por %p3937_p5, %p3936_p12 }
  0x8a   : > { %p3934_p11 = pneg %p3933_p9 }
  0x8b   : > { %p3940_p4 = por %p3939_p3, %p3938_p0 }
  0x8d   : > { %p3941_p13 = pnand %p3940_p4, %p3934_p11 }
  0x8f   : > { %3944 = shalt.err (!%p3941_p13)
}
  0x90   : > { %s3945_s13 = scalar_lea.vmem %s4698_s15, 2048  ;;  %s4403_s12 = smov [#allocation12]  }
  0x91   : > { %p3946_p2 = scmp.ne.s32.totalorder %s4698_s15, %s3945_s13  ;;  %s3950_s20 = sshll.u32 %s4403_s12, 4  ;;  %s3951_s20 = int_to_ptr.vmem [resolvable:$false] %s3950_s20 }
  0x92   : > { %s3952_s10 = scalar_lea.vmem %s3951_s20, 4096  ;;  %p3953_p1 = scmp.lt.s32.totalorder %s4698_s15, %s3951_s20 }
  0x93   : > { %p3948_p6 = pnand %p3946_p2, %p4626_p10  ;;  %p3954_p9 = scmp.lt.s32.totalorder %s3952_s10, %s3945_s13 }
  0x95   : > { %p3949_p7 = pneg %p3948_p6  ;;  %p3955_p12 = por %p3954_p9, %p3953_p1 }
  0x97   : > { %p3956_p5 = pnand %p3955_p12, %p3949_p7 }
  0x99   : > { %3959 = shalt.err (!%p3956_p5)
}
  0x9a   : > { %s5473_s17 = smov 128   ;;  %s5477_s29 = smov 8  }
  0x9b   : > { %3621 = dma.hbm_to_vmem [thread:$0]  (!%p5505_p8), %s4694_s27, 2048, %s4698_s15, %s5472_s23, %s5473_s17, %s5473_s17, %s5477_s29  }
  0x9c   : > { %s4732_s12 = scalar_lea.hbm %s5438_s7, %s3318_s19  ;;  %s642_s20 = scalar_lea.vmem [#allocation15], %s3178_s16 }
  0x9d   : > { %s649_s10 = sshll.u32 %s642_s20, 4  ;;  %s4737_s8 = sshll.u32 %s4390_s22, 4  ;;  %s4739_s10 = int_to_ptr.vmem [resolvable:$true] %s649_s10 }
  0x9e   : > { %s5476_s21 = scalar_lea.sflag [#allocation16], %s4586_s30  ;;  %s3960_s3 = scalar_lea.hbm %s4732_s12, 2048 }
  0x9f   : > { %p3961_p11 = scmp.ne.s32.totalorder %s4732_s12, %s3960_s3  ;;  %s3965_s15 = scalar_lea.hbm %s5438_s7, 4096 }
  0xa0   : > { %p3966_p4 = scmp.lt.u32.totalorder %s4732_s12, %s5438_s7  ;;  %p3967_p13 = scmp.lt.u32.totalorder %s3965_s15, %s3960_s3 }
  0xa1   : > { %p3963_p0 = pnand %p3961_p11, %p4626_p10  ;;  %p3969_p6 = scmp.lt.u32.totalorder %s3960_s3, %s4732_s12 }
  0xa2   : > { %p3968_p2 = por %p3967_p13, %p3966_p4 }
  0xa3   : > { %p3964_p3 = pneg %p3963_p0 }
  0xa4   : > { %p3970_p7 = por %p3969_p6, %p3968_p2 }
  0xa6   : > { %p3971_p1 = pnand %p3970_p7, %p3964_p3 }
  0xa8   : > { %3974 = shalt.err (!%p3971_p1)
}
  0xa9   : > { %s3975_s16 = scalar_lea.vmem %s4739_s10, 2048  ;;  %s4406_s20 = smov [#allocation15]  }
  0xaa   : > { %p3976_p9 = scmp.ne.s32.totalorder %s4739_s10, %s3975_s16  ;;  %s3980_s27 = sshll.u32 %s4406_s20, 4  ;;  %s3981_s27 = int_to_ptr.vmem [resolvable:$false] %s3980_s27 }
  0xab   : > { %s3982_s19 = scalar_lea.vmem %s3981_s27, 4096  ;;  %p3983_p11 = scmp.lt.s32.totalorder %s4739_s10, %s3981_s27 }
  0xac   : > { %p3978_p12 = pnand %p3976_p9, %p4626_p10  ;;  %p3984_p0 = scmp.lt.s32.totalorder %s3982_s19, %s3975_s16 }
  0xae   : > { %p3979_p5 = pneg %p3978_p12  ;;  %p3985_p4 = por %p3984_p0, %p3983_p11 }
  0xb0   : > { %p3986_p13 = pnand %p3985_p4, %p3979_p5 }
  0xb2   : > { %3989 = shalt.err (!%p3986_p13)
}
  0xb3   : > { %s5509_s3 = smov 4   ;;  %s5510_s15 = smov 64  }
  0xb4   : > { %3627 = dma.hbm_to_vmem [thread:$0]  (!%p5505_p8), %s4732_s12, 2048, %s4739_s10, %s5476_s21, %s5510_s15, %s5510_s15, %s5509_s3  }
  0xb5   : > { %s4772_s16 = scalar_lea.hbm %s5440_s9, %s4737_s8  ;;  %s679_s20 = scalar_lea.vmem [#allocation18], %s4577_s25 }
  0xb6   : > { %s686_s27 = sshll.u32 %s679_s20, 4  ;;  %s5475_s19 = scalar_lea.sflag [#allocation19], %s4586_s30  ;;  %s687_s27 = int_to_ptr.vmem [resolvable:$true] %s686_s27 }
  0xb7   : > { %s3990_s23 = scalar_lea.hbm %s4772_s16, 16  ;;  %s3995_s10 = scalar_lea.hbm %s5440_s9, 32 }
  0xb8   : > { %p3991_p3 = scmp.ne.s32.totalorder %s4772_s16, %s3990_s23  ;;  %p3996_p7 = scmp.lt.u32.totalorder %s4772_s16, %s5440_s9 }
  0xb9   : > { %p3997_p1 = scmp.lt.u32.totalorder %s3995_s10, %s3990_s23  ;;  %p3999_p12 = scmp.lt.u32.totalorder %s3990_s23, %s4772_s16 }
  0xba   : > { %p3993_p2 = pnand %p3991_p3, %p4626_p10 }
  0xbb   : > { %p3998_p9 = por %p3997_p1, %p3996_p7 }
  0xbc   : > { %p3994_p6 = pneg %p3993_p2 }
  0xbd   : > { %p4000_p5 = por %p3999_p12, %p3998_p9 }
  0xbf   : > { %p4001_p11 = pnand %p4000_p5, %p3994_p6 }
  0xc1   : > { %4004 = shalt.err (!%p4001_p11)
}
  0xc2   : > { %s4005_s1 = scalar_lea.vmem %s687_s27, 16  ;;  %s4407_s13 = smov [#allocation18]  }
  0xc3   : > { %p4006_p0 = scmp.ne.s32.totalorder %s687_s27, %s4005_s1  ;;  %s4010_s20 = sshll.u32 %s4407_s13, 4  ;;  %s4011_s20 = int_to_ptr.vmem [resolvable:$false] %s4010_s20 }
  0xc4   : > { %s4012_s17 = scalar_lea.vmem %s4011_s20, 32  ;;  %p4013_p3 = scmp.lt.s32.totalorder %s687_s27, %s4011_s20 }
  0xc5   : > { %p4008_p4 = pnand %p4006_p0, %p4626_p10  ;;  %p4014_p2 = scmp.lt.s32.totalorder %s4012_s17, %s4005_s1 }
  0xc7   : > { %p4009_p13 = pneg %p4008_p4  ;;  %p4015_p8 = por %p4014_p2, %p4013_p3 }
  0xc9   : > { %p4016_p1 = pnand %p4015_p8, %p4009_p13 }
  0xcb   : > { %4019 = shalt.err (!%p4016_p1)
}
  0xcc   : > { %p5511_p7 = scmp.ne.s32.totalorder %s5501_s26, 0  ;;  %s4799_s10 = scalar_lea.hbm %s5442_s11, %s4737_s8 }
  0xcd   : > { %s713_s3 = scalar_lea.vmem [#allocation21], %s4577_s25  ;;  %s5478_s1 = scalar_lea.sflag [#allocation22], %s4586_s30 }
  0xce   : > { %3633 = dma.hbm_to_vmem [thread:$0]  (!%p5511_p7), %s4772_s16, 16, %s687_s27, %s5475_s19  }
  0xcf   : > { %s720_s15 = sshll.u32 %s713_s3, 4  ;;  %s4020_s13 = scalar_lea.hbm %s4799_s10, 16  ;;  %s721_s15 = int_to_ptr.vmem [resolvable:$true] %s720_s15 }
  0xd0   : > { %p4021_p8 = scmp.ne.s32.totalorder %s4799_s10, %s4020_s13  ;;  %s4025_s27 = scalar_lea.hbm %s5442_s11, 32 }
  0xd1   : > { %p4026_p12 = scmp.lt.u32.totalorder %s4799_s10, %s5442_s11  ;;  %p4027_p5 = scmp.lt.u32.totalorder %s4025_s27, %s4020_s13 }
  0xd2   : > { %p4023_p6 = pnand %p4021_p8, %p4626_p10  ;;  %p4029_p0 = scmp.lt.u32.totalorder %s4020_s13, %s4799_s10 }
  0xd3   : > { %p4028_p11 = por %p4027_p5, %p4026_p12 }
  0xd4   : > { %p4024_p9 = pneg %p4023_p6 }
  0xd5   : > { %p4030_p4 = por %p4029_p0, %p4028_p11 }
  0xd7   : > { %p4031_p13 = pnand %p4030_p4, %p4024_p9 }
  0xd9   : > { %4034 = shalt.err (!%p4031_p13)
}
  0xda   : > { %s4035_s12 = scalar_lea.vmem %s721_s15, 16  ;;  %s4408_s3 = smov [#allocation21]  }
  0xdb   : > { %p4036_p3 = scmp.ne.s32.totalorder %s721_s15, %s4035_s12  ;;  %s4040_s19 = sshll.u32 %s4408_s3, 4  ;;  %s4041_s19 = int_to_ptr.vmem [resolvable:$false] %s4040_s19 }
  0xdc   : > { %s4042_s20 = scalar_lea.vmem %s4041_s19, 32  ;;  %p4043_p8 = scmp.lt.s32.totalorder %s721_s15, %s4041_s19 }
  0xdd   : > { %p4038_p2 = pnand %p4036_p3, %p4626_p10  ;;  %p4044_p6 = scmp.lt.s32.totalorder %s4042_s20, %s4035_s12 }
  0xdf   : > { %p4039_p1 = pneg %p4038_p2  ;;  %p4045_p7 = por %p4044_p6, %p4043_p8 }
  0xe1   : > { %p4046_p5 = pnand %p4045_p7, %p4039_p1 }
  0xe3   : > { %4049 = shalt.err (!%p4046_p5)
}
  0xe4   : > { %p5512_p12 = scmp.ne.s32.totalorder %s5501_s26, 0  ;;  %s4409_s13 = smov [#allocation3]  }
  0xe5   : > { %s484_s16 = sshll.u32 %s4409_s13, 4  ;;  %s4410_s27 = smov [#allocation26]   ;;  %s485_s16 = int_to_ptr.vmem [resolvable:$true] %s484_s16 }
  0xe6   : > { %3639 = dma.hbm_to_vmem [thread:$0]  (!%p5512_p12), %s4799_s10, 16, %s721_s15, %s5478_s1  }
  0xe7   : > { %s509_s17 = sshll.u32 %s4410_s27, 4  ;;  %s4050_s19 = scalar_lea.hbm %s5431_s0, 256  ;;  %s510_s17 = int_to_ptr.vmem [resolvable:$true] %s509_s17 }
  0xe8   : > { %p4051_p7 = scmp.ne.s32.totalorder %s5431_s0, %s4050_s19  ;;  %p5513_p9 = scmp.ne.s32.totalorder %s5503_s24, 0 }
  0xe9   : > { %p4057_p4 = scmp.lt.u32.totalorder %s4050_s19, %s5431_s0 }
  0xea   : > { %p4053_p11 = pnand %p4051_p7, %p5513_p9 }
  0xec   : > { %p4054_p0 = pneg %p4053_p11 }
  0xee   : > { %p4059_p13 = pnand %p4057_p4, %p4054_p0 }
  0xf0   : > { %4062 = shalt.err (!%p4059_p13)
}
  0xf1   : > { %s4063_s10 = scalar_lea.vmem %s485_s16, 256  ;;  %p4071_p8 = scmp.lt.s32.totalorder %s485_s16, %s485_s16 }
  0xf2   : > { %p4064_p3 = scmp.ne.s32.totalorder %s485_s16, %s4063_s10  ;;  %p4072_p6 = scmp.lt.s32.totalorder %s4063_s10, %s4063_s10 }
  0xf4   : > { %p4066_p2 = pnand %p4064_p3, %p5513_p9  ;;  %p4073_p5 = por %p4072_p6, %p4071_p8 }
  0xf6   : > { %p4067_p1 = pneg %p4066_p2 }
  0xf8   : > { %p4074_p12 = pnand %p4073_p5, %p4067_p1 }
  0xfa   : > { %4077 = shalt.err (!%p4074_p12)
}
  0xfb   : > { %p5514_p7 = scmp.ne.s32.totalorder %s5500_s28, 0  ;;  %s5515_s15 = smov 8  }
  0xfc   : > { %s5516_s13 = smov 128   ;;  %s3552_s27 = smul.u32 3, %s4577_s25 }
  0xfd   : > { %3599 = dma.hbm_to_vmem [thread:$0]  (!%p5514_p7), %s5431_s0, 256, %s485_s16, [#allocation4], %s5516_s13, %s5516_s13, %s5515_s15  }
  0xfe   : > { %s4078_s19 = scalar_lea.hbm %s5445_s14, 16 }
  0xff   : > { %p4079_p12 = scmp.ne.s32.totalorder %s5445_s14, %s4078_s19  ;;  %p4085_p4 = scmp.lt.u32.totalorder %s4078_s19, %s5445_s14 }
 0x101   : > { %p4081_p11 = pnand %p4079_p12, %p5513_p9 }
 0x103   : > { %p4082_p0 = pneg %p4081_p11 }
 0x105   : > { %p4087_p13 = pnand %p4085_p4, %p4082_p0 }
 0x107   : > { %4090 = shalt.err (!%p4087_p13)
}
 0x108   : > { %s4091_s16 = scalar_lea.vmem %s510_s17, 16  ;;  %s4098_s15 = scalar_lea.vmem %s510_s17, 32 }
 0x109   : > { %p4092_p3 = scmp.ne.s32.totalorder %s510_s17, %s4091_s16  ;;  %p4099_p8 = scmp.lt.s32.totalorder %s510_s17, %s510_s17 }
 0x10a   : > { %p4100_p6 = scmp.lt.s32.totalorder %s4098_s15, %s4091_s16 }
 0x10b   : > { %p4094_p2 = pnand %p4092_p3, %p5513_p9 }
 0x10c   : > { %p4101_p5 = por %p4100_p6, %p4099_p8 }
 0x10d   : > { %p4095_p1 = pneg %p4094_p2 }
 0x10f   : > { %p4102_p10 = pnand %p4101_p5, %p4095_p1 }
 0x111   : > { %4105 = shalt.err (!%p4102_p10)
}
 0x112   : > { %3605 = dma.hbm_to_vmem [thread:$0]  (!%p5514_p7), %s5445_s14, 16, %s510_s17, [#allocation25]  }
 0x113   : > { %s3553_s1 = smul.u32 48, %s4390_s22  ;;  %s545_s29 = scalar_lea.vmem [#allocation8], %s3552_s27 }
 0x114   : > { %s553_s23 = sshll.u32 %s545_s29, 4  ;;  %p5517_p12 = scmp.ne.s32.totalorder %s5506_s18, 0  ;;  %s554_s23 = int_to_ptr.vmem [resolvable:$true] %s553_s23 }
 0x115   : > { %s551_s19 = scalar_lea.hbm %s5433_s2, %s3553_s1  ;;  %s4111_s10 = scalar_lea.hbm %s5433_s2, 96 }
 0x116   : > { %s4106_s12 = scalar_lea.hbm %s551_s19, 48  ;;  %p4112_p7 = scmp.lt.u32.totalorder %s551_s19, %s5433_s2 }
 0x117   : > { %p4107_p9 = scmp.ne.s32.totalorder %s551_s19, %s4106_s12  ;;  %p4113_p0 = scmp.lt.u32.totalorder %s4111_s10, %s4106_s12 }
 0x118   : > { %p4115_p13 = scmp.lt.u32.totalorder %s4106_s12, %s551_s19 }
 0x119   : > { %p4109_p10 = pnand %p4107_p9, %p5517_p12  ;;  %p4114_p4 = por %p4113_p0, %p4112_p7 }
 0x11b   : > { %p4110_p11 = pneg %p4109_p10  ;;  %p4116_p3 = por %p4115_p13, %p4114_p4 }
 0x11d   : > { %p4117_p2 = pnand %p4116_p3, %p4110_p11 }
 0x11f   : > { %4120 = shalt.err (!%p4117_p2)
}
 0x120   : > { %s4121_s17 = scalar_lea.vmem %s554_s23, 48  ;;  %s4411_s27 = smov [#allocation8]  }
 0x121   : > { %p4122_p1 = scmp.ne.s32.totalorder %s554_s23, %s4121_s17  ;;  %s4126_s13 = sshll.u32 %s4411_s27, 4  ;;  %s4127_s13 = int_to_ptr.vmem [resolvable:$false] %s4126_s13 }
 0x122   : > { %s4128_s21 = scalar_lea.vmem %s4127_s13, 96  ;;  %p4129_p5 = scmp.lt.s32.totalorder %s554_s23, %s4127_s13 }
 0x123   : > { %p4124_p8 = pnand %p4122_p1, %p5517_p12  ;;  %p4130_p9 = scmp.lt.s32.totalorder %s4128_s21, %s4121_s17 }
 0x125   : > { %p4125_p6 = pneg %p4124_p8  ;;  %p4131_p10 = por %p4130_p9, %p4129_p5 }
 0x127   : > { %p4132_p0 = pnand %p4131_p10, %p4125_p6 }
 0x129   : > { %4135 = shalt.err (!%p4132_p0)
}
 0x12a   : > { %p5518_p7 = scmp.ne.s32.totalorder %s5501_s26, 0  ;;  %s5519_s1 = scalar_lea.sflag [#allocation7], %s4586_s30 }
 0x12b   : > { %s4884_s3 = scalar_lea.hbm %s5435_s4, %s4737_s8  ;;  %s584_s12 = scalar_lea.vmem [#allocation11], %s4577_s25 }
 0x12c   : > { %3612 = dma.hbm_to_vmem [thread:$0]  (!%p5518_p7), %s551_s19, 48, %s554_s23, %s5519_s1  }
 0x12d   : > { %s591_s28 = sshll.u32 %s584_s12, 4  ;;  %s3181_s20 = sshll.u32 %s4577_s25, 1  ;;  %s592_s28 = int_to_ptr.vmem [resolvable:$true] %s591_s28 }
 0x12e   : > { %s4136_s10 = scalar_lea.hbm %s4884_s3, 16  ;;  %s4141_s19 = scalar_lea.hbm %s5435_s4, 32 }
 0x12f   : > { %p4137_p11 = scmp.ne.s32.totalorder %s4884_s3, %s4136_s10  ;;  %p4142_p3 = scmp.lt.u32.totalorder %s4884_s3, %s5435_s4 }
 0x130   : > { %p4143_p2 = scmp.lt.u32.totalorder %s4141_s19, %s4136_s10  ;;  %p4145_p8 = scmp.lt.u32.totalorder %s4136_s10, %s4884_s3 }
 0x131   : > { %p4139_p4 = pnand %p4137_p11, %p5517_p12 }
 0x132   : > { %p4144_p1 = por %p4143_p2, %p4142_p3 }
 0x133   : > { %p4140_p13 = pneg %p4139_p4 }
 0x134   : > { %p4146_p6 = por %p4145_p8, %p4144_p1 }
 0x136   : > { %p4147_p5 = pnand %p4146_p6, %p4140_p13 }
 0x138   : > { %4150 = shalt.err (!%p4147_p5)
}
 0x139   : > { %s4151_s27 = scalar_lea.vmem %s592_s28, 16  ;;  %s4412_s13 = smov [#allocation11]  }
 0x13a   : > { %p4152_p9 = scmp.ne.s32.totalorder %s592_s28, %s4151_s27  ;;  %s4156_s21 = sshll.u32 %s4412_s13, 4  ;;  %s4157_s21 = int_to_ptr.vmem [resolvable:$false] %s4156_s21 }
 0x13b   : > { %s4158_s1 = scalar_lea.vmem %s4157_s21, 32  ;;  %p4159_p11 = scmp.lt.s32.totalorder %s592_s28, %s4157_s21 }
 0x13c   : > { %p4154_p10 = pnand %p4152_p9, %p5517_p12  ;;  %p4160_p4 = scmp.lt.s32.totalorder %s4158_s1, %s4151_s27 }
 0x13e   : > { %p4155_p0 = pneg %p4154_p10  ;;  %p4161_p7 = por %p4160_p4, %p4159_p11 }
 0x140   : > { %p4162_p2 = pnand %p4161_p7, %p4155_p0 }
 0x142   : > { %4165 = shalt.err (!%p4162_p2)
}
 0x143   : > { %p5520_p3 = scmp.ne.s32.totalorder %s5501_s26, 0  ;;  %s5521_s29 = scalar_lea.sflag [#allocation10], %s4586_s30 }
 0x144   : > { %s3319_s24 = sshll.u32 %s4390_s22, 5  ;;  %s623_s23 = scalar_lea.vmem [#allocation14], %s3181_s20 }
 0x145   : > { %3618 = dma.hbm_to_vmem [thread:$0]  (!%p5520_p3), %s4884_s3, 16, %s592_s28, %s5521_s29  }
 0x146   : > { %s4911_s16 = scalar_lea.hbm %s5437_s6, %s3319_s24  ;;  %s631_s19 = sshll.u32 %s623_s23, 4  ;;  %s632_s19 = int_to_ptr.vmem [resolvable:$true] %s631_s19 }
 0x147   : > { %s4166_s15 = scalar_lea.hbm %s4911_s16, 32  ;;  %s4171_s17 = scalar_lea.hbm %s5437_s6, 64 }
 0x148   : > { %p4167_p7 = scmp.ne.s32.totalorder %s4911_s16, %s4166_s15  ;;  %p4172_p8 = scmp.lt.u32.totalorder %s4911_s16, %s5437_s6 }
 0x149   : > { %p4173_p6 = scmp.lt.u32.totalorder %s4171_s17, %s4166_s15  ;;  %p4175_p9 = scmp.lt.u32.totalorder %s4166_s15, %s4911_s16 }
 0x14a   : > { %p4169_p13 = pnand %p4167_p7, %p5517_p12 }
 0x14b   : > { %p4174_p5 = por %p4173_p6, %p4172_p8 }
 0x14c   : > { %p4170_p1 = pneg %p4169_p13 }
 0x14d   : > { %p4176_p10 = por %p4175_p9, %p4174_p5 }
 0x14f   : > { %p4177_p0 = pnand %p4176_p10, %p4170_p1 }
 0x151   : > { %4180 = shalt.err (!%p4177_p0)
}
 0x152   : > { %s4181_s20 = scalar_lea.vmem %s632_s19, 32  ;;  %s4413_s21 = smov [#allocation14]  }
 0x153   : > { %p4182_p11 = scmp.ne.s32.totalorder %s632_s19, %s4181_s20  ;;  %s4186_s1 = sshll.u32 %s4413_s21, 4  ;;  %s4187_s1 = int_to_ptr.vmem [resolvable:$false] %s4186_s1 }
 0x154   : > { %s4188_s29 = scalar_lea.vmem %s4187_s1, 64  ;;  %p4189_p7 = scmp.lt.s32.totalorder %s632_s19, %s4187_s1 }
 0x155   : > { %p4184_p4 = pnand %p4182_p11, %p5517_p12  ;;  %p4190_p13 = scmp.lt.s32.totalorder %s4188_s29, %s4181_s20 }
 0x157   : > { %p4185_p2 = pneg %p4184_p4  ;;  %p4191_p3 = por %p4190_p13, %p4189_p7 }
 0x159   : > { %p4192_p6 = pnand %p4191_p3, %p4185_p2 }
 0x15b   : > { %4195 = shalt.err (!%p4192_p6)
}
 0x15c   : > { %p5522_p8 = scmp.ne.s32.totalorder %s5501_s26, 0  ;;  %s5523_s24 = scalar_lea.sflag [#allocation13], %s4586_s30 }
 0x15d   : > { %s5524_s23 = sld [smem:[#allocation48_spill]]  ;;  %s662_s28 = scalar_lea.vmem [#allocation17], %s4577_s25 }
 0x15e   : > { %3624 = dma.hbm_to_vmem [thread:$0]  (!%p5522_p8), %s4911_s16, 32, %s632_s19, %s5523_s24  }
 0x15f   : > { %s669_s17 = sshll.u32 %s662_s28, 4  ;;  %s670_s17 = int_to_ptr.vmem [resolvable:$true] %s669_s17 }
 0x163   : > { %s5525_s15 = smov %s5524_s23  ;;  %s4938_s3 = scalar_lea.hbm %s5524_s23, %s4737_s8 }
 0x164   : > { %s4196_s27 = scalar_lea.hbm %s4938_s3, 16  ;;  %s4201_s16 = scalar_lea.hbm %s5525_s15, 32 }
 0x165   : > { %p4197_p3 = scmp.ne.s32.totalorder %s4938_s3, %s4196_s27  ;;  %p4202_p9 = scmp.lt.u32.totalorder %s4938_s3, %s5525_s15 }
 0x166   : > { %p4203_p10 = scmp.lt.u32.totalorder %s4201_s16, %s4196_s27  ;;  %p4205_p11 = scmp.lt.u32.totalorder %s4196_s27, %s4938_s3 }
 0x167   : > { %p4199_p1 = pnand %p4197_p3, %p5517_p12 }
 0x168   : > { %p4204_p0 = por %p4203_p10, %p4202_p9 }
 0x169   : > { %p4200_p5 = pneg %p4199_p1 }
 0x16a   : > { %p4206_p4 = por %p4205_p11, %p4204_p0 }
 0x16c   : > { %p4207_p2 = pnand %p4206_p4, %p4200_p5 }
 0x16e   : > { %4210 = shalt.err (!%p4207_p2)
}
 0x16f   : > { %s4211_s1 = scalar_lea.vmem %s670_s17, 16  ;;  %s4414_s29 = smov [#allocation17]  }
 0x170   : > { %p4212_p7 = scmp.ne.s32.totalorder %s670_s17, %s4211_s1  ;;  %s4216_s24 = sshll.u32 %s4414_s29, 4  ;;  %s4217_s24 = int_to_ptr.vmem [resolvable:$false] %s4216_s24 }
 0x171   : > { %s4218_s12 = scalar_lea.vmem %s4217_s24, 32  ;;  %p4219_p3 = scmp.lt.s32.totalorder %s670_s17, %s4217_s24 }
 0x172   : > { %p4214_p13 = pnand %p4212_p7, %p5517_p12  ;;  %p4220_p1 = scmp.lt.s32.totalorder %s4218_s12, %s4211_s1 }
 0x174   : > { %p4215_p6 = pneg %p4214_p13  ;;  %p4221_p8 = por %p4220_p1, %p4219_p3 }
 0x176   : > { %p4222_p9 = pnand %p4221_p8, %p4215_p6 }
 0x178   : > { %4225 = shalt.err (!%p4222_p9)
}
 0x179   : > { %p5526_p10 = scmp.ne.s32.totalorder %s5501_s26, 0  ;;  %s5527_s10 = scalar_lea.sflag [#allocation16], %s4586_s30 }
 0x17a   : > { %s5528_s27 = sld [smem:[#allocation49_spill]]  ;;  %s696_s20 = scalar_lea.vmem [#allocation20], %s4577_s25 }
 0x17b   : > { %3630 = dma.hbm_to_vmem [thread:$0]  (!%p5526_p10), %s4938_s3, 16, %s670_s17, %s5527_s10  }
 0x17c   : > { %s703_s16 = sshll.u32 %s696_s20, 4  ;;  %s704_s16 = int_to_ptr.vmem [resolvable:$true] %s703_s16 }
 0x180   : > { %s4964_s13 = scalar_lea.hbm %s5528_s27, %s4737_s8  ;;  %s4231_s3 = scalar_lea.hbm %s5528_s27, 32 }
 0x181   : > { %s4226_s19 = scalar_lea.hbm %s4964_s13, 16  ;;  %p4232_p11 = scmp.lt.u32.totalorder %s4964_s13, %s5528_s27 }
 0x182   : > { %p4227_p8 = scmp.ne.s32.totalorder %s4964_s13, %s4226_s19  ;;  %p4233_p4 = scmp.lt.u32.totalorder %s4231_s3, %s4226_s19 }
 0x183   : > { %p4235_p7 = scmp.lt.u32.totalorder %s4226_s19, %s4964_s13 }
 0x184   : > { %p4229_p5 = pnand %p4227_p8, %p5517_p12  ;;  %p4234_p2 = por %p4233_p4, %p4232_p11 }
 0x186   : > { %p4230_p0 = pneg %p4229_p5  ;;  %p4236_p13 = por %p4235_p7, %p4234_p2 }
 0x188   : > { %p4237_p6 = pnand %p4236_p13, %p4230_p0 }
 0x18a   : > { %4240 = shalt.err (!%p4237_p6)
}
 0x18b   : > { %s4241_s24 = scalar_lea.vmem %s704_s16, 16  ;;  %s4415_s12 = smov [#allocation20]  }
 0x18c   : > { %p4242_p3 = scmp.ne.s32.totalorder %s704_s16, %s4241_s24  ;;  %s4246_s10 = sshll.u32 %s4415_s12, 4  ;;  %s4247_s10 = int_to_ptr.vmem [resolvable:$false] %s4246_s10 }
 0x18d   : > { %s4248_s23 = scalar_lea.vmem %s4247_s10, 32  ;;  %p4249_p8 = scmp.lt.s32.totalorder %s704_s16, %s4247_s10 }
 0x18e   : > { %p4244_p1 = pnand %p4242_p3, %p5517_p12  ;;  %p4250_p5 = scmp.lt.s32.totalorder %s4248_s23, %s4241_s24 }
 0x190   : > { %p4245_p9 = pneg %p4244_p1  ;;  %p4251_p10 = por %p4250_p5, %p4249_p8 }
 0x192   : > { %p4252_p4 = pnand %p4251_p10, %p4245_p9 }
 0x194   : > { %4255 = shalt.err (!%p4252_p4)
}
 0x195   : > { %p5529_p11 = scmp.ne.s32.totalorder %s5501_s26, 0  ;;  %s5530_s28 = scalar_lea.sflag [#allocation19], %s4586_s30 }
 0x196   : > { %s5531_s21 = sld [smem:[#allocation50_spill]]  ;;  %s730_s17 = scalar_lea.vmem [#allocation23], %s4577_s25 }
 0x197   : > { %3636 = dma.hbm_to_vmem [thread:$0]  (!%p5529_p11), %s4964_s13, 16, %s704_s16, %s5530_s28  }
 0x198   : > { %s737_s29 = sshll.u32 %s730_s17, 4  ;;  %s738_s29 = int_to_ptr.vmem [resolvable:$true] %s737_s29 }
 0x19c   : > { %s5532_s1 = smov %s5531_s21  ;;  %s4990_s3 = scalar_lea.hbm %s5531_s21, %s4737_s8 }
 0x19d   : > { %s4256_s24 = scalar_lea.hbm %s4990_s3, 16  ;;  %s4261_s13 = scalar_lea.hbm %s5532_s1, 32 }
 0x19e   : > { %p4257_p10 = scmp.ne.s32.totalorder %s4990_s3, %s4256_s24  ;;  %p4262_p7 = scmp.lt.u32.totalorder %s4990_s3, %s5532_s1 }
 0x19f   : > { %p4263_p13 = scmp.lt.u32.totalorder %s4261_s13, %s4256_s24  ;;  %p4265_p3 = scmp.lt.u32.totalorder %s4256_s24, %s4990_s3 }
 0x1a0   : > { %p4259_p0 = pnand %p4257_p10, %p5517_p12 }
 0x1a1   : > { %p4264_p6 = por %p4263_p13, %p4262_p7 }
 0x1a2   : > { %p4260_p2 = pneg %p4259_p0 }
 0x1a3   : > { %p4266_p1 = por %p4265_p3, %p4264_p6 }
 0x1a5   : > { %p4267_p9 = pnand %p4266_p1, %p4260_p2 }
 0x1a7   : > { %4270 = shalt.err (!%p4267_p9)
}
 0x1a8   : > { %s4271_s25 = scalar_lea.vmem %s738_s29, 16  ;;  %s4416_s8 = smov [#allocation23]  }
 0x1a9   : > { %p4272_p8 = scmp.ne.s32.totalorder %s738_s29, %s4271_s25  ;;  %s4276_s28 = sshll.u32 %s4416_s8, 4  ;;  %s4277_s28 = int_to_ptr.vmem [resolvable:$false] %s4276_s28 }
 0x1aa   : > { %s4278_s20 = scalar_lea.vmem %s4277_s28, 32  ;;  %p4279_p10 = scmp.lt.s32.totalorder %s738_s29, %s4277_s28 }
 0x1ab   : > { %p4274_p5 = pnand %p4272_p8, %p5517_p12  ;;  %p4280_p0 = scmp.lt.s32.totalorder %s4278_s20, %s4271_s25 }
 0x1ad   : > { %p4275_p4 = pneg %p4274_p5  ;;  %p4281_p11 = por %p4280_p0, %p4279_p10 }
 0x1af   : > { %p4282_p7 = pnand %p4281_p11, %p4275_p4 }
 0x1b1   : > { %4285 = shalt.err (!%p4282_p7)
}
 0x1b2   : > { %p5533_p13 = scmp.ne.s32.totalorder %s5501_s26, 0  ;;  %s5534_s19 = scalar_lea.sflag [#allocation22], %s4586_s30 }
 0x1b3   : > { %s5535_s21 = sld [smem:[#allocation45_spill]] }
 0x1b4   : > { %3642 = dma.hbm_to_vmem [thread:$0]  (!%p5533_p13), %s4990_s3, 16, %s738_s29, %s5534_s19  }
 0x1b9   : > { %p5536_p2 = scmp.ne.s32.totalorder %s5535_s21, 0 }
 0x1ba   : > { %s5537_s18 = sld [smem:[#allocation41_spill]] (!%p5536_p2) }
 0x1bb   : > { %746 = sbr.rel (%p5536_p2) target bundleno = 5183 (0x143f), region = 80 }
 0x1c0   : > { %p5538_p12 = scmp.eq.s32.totalorder (!%p5536_p2), %s5537_s18, 0 }
 0x1c2   : > { %4337 = dma.done.wait (%p5538_p12), [#allocation4], 256   ;;  %p5539_p6 = pmov %p5538_p12 }
 0x1c3   : > { %s5540_s17 = sld [smem:[#allocation37_spill]]  ;;  %s5541_s24 = sld [smem:[#allocation43_spill]] }
 0x1c4   : > { %4339 = vsyncadd (%p5539_p6), [#allocation4], 4294967040  ;;  %s5019_s12 = sand.u32 1, %s5537_s18  }
 0x1c5   : > { %s753_s3 = scalar_lea.sflag [#allocation7], %s5019_s12 }
 0x1c9   : > { %s5022_s26 = sand.u32 1, %s5540_s17   ;;  %p5542_p11 = scmp.ne.s32.totalorder %s5541_s24, 0 }
 0x1ca   : > { %s3554_s30 = smul.u32 192, %s5022_s26 }
 0x1cc   : > { %s5026_s29 = scalar_lea.vmem [#allocation6], %s3554_s30 }
 0x1cd   : > { %4341 = dma.done.wait (%p5542_p11), %s753_s3, 3120  }
 0x1ce   : > { %4343 = vsyncadd (%p5542_p11), %s753_s3, 4294964176  ;;  %s3555_s10 = smul.u32 3, %s5022_s26  ;;  %s3194_s13 = sshll.u32 %s5022_s26, 6 }
 0x1cf   : > { %s771_s23 = scalar_lea.sflag [#allocation10], %s5019_s12  ;;  %s5037_s25 = scalar_lea.vmem [#allocation9], %s3194_s13 }
 0x1d0   : > { %s5034_s16 = scalar_lea.vmem [#allocation8], %s3555_s10 }
 0x1d1   : > { %4345 = dma.done.wait (%p5542_p11), %s771_s23, 1040  }
 0x1d2   : > { %4347 = vsyncadd (%p5542_p11), %s771_s23, 4294966256  ;;  %s3195_s8 = sshll.u32 %s5022_s26, 7  ;;  %s782_s28 = scalar_lea.vmem [#allocation11], %s5022_s26 }
 0x1d3   : > { %s788_s20 = scalar_lea.sflag [#allocation13], %s5019_s12  ;;  %s5046_s19 = scalar_lea.vmem [#allocation12], %s3195_s8 }
 0x1d4   : > { %4349 = dma.done.wait (%p5542_p11), %s788_s20, 2080  }
 0x1d5   : > { %4351 = vsyncadd (%p5542_p11), %s788_s20, 4294965216  ;;  %s3196_s21 = sshll.u32 %s5022_s26, 1  ;;  %s806_s30 = scalar_lea.sflag [#allocation16], %s5019_s12 }
 0x1d6   : > { %s5053_s17 = scalar_lea.vmem [#allocation14], %s3196_s21  ;;  %s5056_s3 = scalar_lea.vmem [#allocation15], %s3195_s8 }
 0x1d7   : > { %4353 = dma.done.wait (%p5542_p11), %s806_s30, 2064  }
 0x1d8   : > { %4355 = vsyncadd (%p5542_p11), %s806_s30, 4294965232  ;;  %s817_s10 = scalar_lea.vmem [#allocation17], %s5022_s26  ;;  %s823_s13 = scalar_lea.sflag [#allocation19], %s5019_s12 }
 0x1d9   : > { %s825_s23 = scalar_lea.vmem [#allocation18], %s5022_s26 }
 0x1da   : > { %4357 = dma.done.wait (%p5542_p11), %s823_s13, 32  }
 0x1db   : > { %4359 = vsyncadd (%p5542_p11), %s823_s13, 4294967264  ;;  %s833_s8 = scalar_lea.vmem [#allocation20], %s5022_s26  ;;  %s839_s20 = scalar_lea.sflag [#allocation22], %s5019_s12 }
 0x1dc   : > { %s841_s21 = scalar_lea.vmem [#allocation21], %s5022_s26 }
 0x1dd   : > { %4361 = dma.done.wait (%p5542_p11), %s839_s20, 32  }
 0x1de   : > { %4363 = vsyncadd (%p5542_p11), %s839_s20, 4294967264  ;;  %s849_s30 = scalar_lea.vmem [#allocation23], %s5022_s26  ;;  %p5543_p3 = pmov %p5539_p6 }
 0x1e0   : > { %4365 = dma.done.wait (%p5543_p3), [#allocation25], 32   ;;  %p5544_p1 = pmov %p5543_p3 }
 0x1e1   : > { %s5545_s13 = sld [smem:[#allocation39_spill]] }
 0x1e2   : > { %4367 = vsyncadd (%p5544_p1), [#allocation25], 4294967264 }
 0x1e7   : > { %p3200_p9 = scmp.ne.s32.totalorder %s5545_s13, 0 }
 0x1e8   : > { %v955_v0 = vld [vmem:[#allocation3] sm:$0xff] (!%p3200_p9)  ;;  %v956_v1 = vld [vmem:[#allocation3 + $0x8] sm:$0xff] (!%p3200_p9) }
 0x1e9   : > { %954 = sbr.rel (%p3200_p9) target bundleno = 496 (0x1f0), region = 144  ;;  %957 = vst [vmem:[#allocation2] sm:$0xff] (!%p3200_p9), %v955_v0  ;;  %958 = vst [vmem:[#allocation2 + $0x8] sm:$0xff] (!%p3200_p9), %v956_v1 }
 0x1f0 PF: > { %v3718_v2 = vld [vmem:[%s5026_s29 + $0x4] ss:$12 sps:$4 sm:$0xff]   ;;  %v3720_v3 = vld [vmem:[%s5026_s29] ss:$12 sps:$4 sm:$0xff]   ;;  %v4417_v4 = vmov 0   ;;  %v4418_v5 = vmov 0.0   ;;  %v996_v31 = vlaneseq }
 0x1f1   : > { %1171 = vmatprep.mubr.bf16.mxu0 %v4417_v4  ;;  %3402 = vmatprep.subr.bf16.mxu1 %v4418_v5  ;;  %v3721_v6 = vld [vmem:[%s5026_s29 + $0x1c] ss:$12 sps:$4 sm:$0xff]   ;;  %v3723_v7 = vld [vmem:[%s5026_s29 + $0x18] ss:$12 sps:$4 sm:$0xff]   ;;  %v3724_v8 = vld [vmem:[%s5026_s29 + $0x34] ss:$12 sps:$4 sm:$0xff]  }
 0x1f2   : > { %1139 = vmatprep.subr.bf16.mxu0 %v3718_v2  ;;  %v3726_v9 = vld [vmem:[%s5026_s29 + $0x30] ss:$12 sps:$4 sm:$0xff]   ;;  %v3727_v10 = vld [vmem:[%s5026_s29 + $0x4c] ss:$12 sps:$4 sm:$0xff]   ;;  %v3729_v11 = vld [vmem:[%s5026_s29 + $0x48] ss:$12 sps:$4 sm:$0xff]  }
 0x1f3   : > { %1140 = vmatpush1.bf16.msra.mxu0 %v3720_v3  ;;  %v3730_v12 = vld [vmem:[%s5026_s29 + $0x64] ss:$12 sps:$4 sm:$0xff]   ;;  %v3742_v13 = vld [vmem:[%s5026_s29 + $0x8] ss:$12 sps:$4 sm:$0xff]   ;;  %v3743_v14 = vld [vmem:[%s5026_s29 + $0x20] ss:$12 sps:$4 sm:$0xff]  }
 0x1f4   : > { %1141 = vmatprep.subr.bf16.mxu0 %v3721_v6  ;;  %3403 = vmatpush3.bf16.msra.mxu1 %v3742_v13  ;;  %v3732_v15 = vld [vmem:[%s5026_s29 + $0x60] ss:$12 sps:$4 sm:$0xff]   ;;  %v3733_v16 = vld [vmem:[%s5026_s29 + $0x7c] ss:$12 sps:$4 sm:$0xff]   ;;  %v3735_v17 = vld [vmem:[%s5026_s29 + $0x78] ss:$12 sps:$4 sm:$0xff]  }
 0x1f5   : > { %3404 = vmatprep.subr.bf16.mxu1 %v4418_v5  ;;  %v3736_v18 = vld [vmem:[%s5026_s29 + $0x94] ss:$12 sps:$4 sm:$0xff]   ;;  %v3744_v19 = vld [vmem:[%s5026_s29 + $0x38] ss:$12 sps:$4 sm:$0xff]   ;;  %v3745_v20 = vld [vmem:[%s5026_s29 + $0x50] ss:$12 sps:$4 sm:$0xff]  }
 0x1f6   : > { %v3738_v21 = vld [vmem:[%s5026_s29 + $0x90] ss:$12 sps:$4 sm:$0xff]   ;;  %v3739_v22 = vld [vmem:[%s5026_s29 + $0xac] ss:$12 sps:$4 sm:$0xff]   ;;  %v3746_v23 = vld [vmem:[%s5026_s29 + $0x68] ss:$12 sps:$4 sm:$0xff]  }
 0x1f7   : > { %1142 = vmatpush1.bf16.msra.mxu0 %v3723_v7  ;;  %v3741_v24 = vld [vmem:[%s5026_s29 + $0xa8] ss:$12 sps:$4 sm:$0xff]   ;;  %v5108_v25 = vld [vmem:[#allocation2] sm:$0xff]  ;;  %v3749_v30 = vld [vmem:[%s5026_s29 + $0xb0] ss:$12 sps:$4 sm:$0xff]   ;;  %vm4419_vm0 = vmmov 0  }
 0x1f8   : > { %1143 = vmatprep.subr.bf16.mxu0 %v3724_v8  ;;  %3405 = vmatpush3.bf16.msra.mxu1 %v3743_v14  ;;  %v5110_v26 = vld [vmem:[#allocation2 + $0x8] sm:$0xff]  ;;  %v3748_v29 = vld [vmem:[%s5026_s29 + $0x98] ss:$12 sps:$4 sm:$0xff]   ;;  %v5129_v32 = vshrl.u32 %v996_v31, 7  ;;  %vm1241_vm1 = vcmask 261120   ;;  %s4420_s18 = smov 96  }
 0x1f9   : > { %3406 = vmatprep.subr.bf16.mxu1 %v4418_v5  ;;  %v3747_v27 = vld [vmem:[%s5026_s29 + $0x80] ss:$12 sps:$4 sm:$0xff]   ;;  %v961_v28 = vpack.c.bf16 %v5110_v26, %v5108_v25  ;;  %3418 = vmatprep.mubr.msk.bf16.mxu1 %vm4419_vm0, %v4418_v5  ;;  %vm1362_vm2 = vcmask 1043456   ;;  %vm1334_vm3 = vcmask 64512   ;;  %s4421_s24 = smov 64   ;;  %s4422_s12 = smov 32  }
 0x1fa   : > { %v1002_v33 = vsub.s32 1, %v5129_v32  ;;  %v994_v34 = vld [vmem:[%s5034_s16] sm:$0x7]  ;;  %v998_v36 = vsub.s32 0, %v5129_v32  ;;  %v1006_v52 = vsub.s32 2, %v5129_v32  ;;  %s5546_s29 = sld [smem:[#allocation39_spill]] }
 0x1fb   : > { %1144 = vmatpush1.bf16.msra.mxu0 %v3726_v9  ;;  %v3290_v32 = vld [vmem:[%s817_s10] ss:$0 sm:$0xff] }
 0x1fc   : > { %1145 = vmatprep.subr.bf16.mxu0 %v3727_v10  ;;  %3407 = vmatpush3.bf16.msra.mxu1 %v3744_v19  ;;  %v1003_v35 = vrot.slane %v994_v34, %v1002_v33  ;;  %v999_v42 = vrot.slane %v994_v34, %v998_v36  ;;  %v1007_v53 = vrot.slane %v994_v34, %v1006_v52 }
 0x1fd   : > { %3408 = vmatprep.subr.bf16.mxu1 %v4418_v5 }
 0x1ff   : > { %1146 = vmatpush1.bf16.msra.mxu0 %v3729_v11 }
 0x200   : > { %1147 = vmatprep.subr.bf16.mxu0 %v3730_v12  ;;  %3409 = vmatpush3.bf16.msra.mxu1 %v3745_v20  ;;  %p3309_p8 = scmp.ge.s32.totalorder %s5546_s29, 1 }
 0x201   : > { %3410 = vmatprep.subr.bf16.mxu1 %v4418_v5 }
 0x203   : > { %1148 = vmatpush1.bf16.msra.mxu0 %v3732_v15 }
 0x204   : > { %1149 = vmatprep.subr.bf16.mxu0 %v3733_v16  ;;  %3411 = vmatpush3.bf16.msra.mxu1 %v3746_v23 }
 0x205   : > { %3412 = vmatprep.subr.bf16.mxu1 %v4418_v5 }
 0x207   : > { %1150 = vmatpush1.bf16.msra.mxu0 %v3735_v17 }
 0x208   : > { %1151 = vmatprep.subr.bf16.mxu0 %v3736_v18  ;;  %3413 = vmatpush3.bf16.msra.mxu1 %v3747_v27 }
 0x209   : > { %3414 = vmatprep.subr.bf16.mxu1 %v4418_v5 }
 0x20b   : > { %1152 = vmatpush1.bf16.msra.mxu0 %v3738_v21 }
 0x20c   : > { %1153 = vmatprep.subr.bf16.mxu0 %v3739_v22  ;;  %3415 = vmatpush3.bf16.msra.mxu1 %v3748_v29 }
 0x20d   : > { %3416 = vmatprep.subr.bf16.mxu1 %v4418_v5 }
 0x20f   : > { %1154 = vmatpush1.bf16.msra.mxu0 %v3741_v24 }
 0x210   : > { %3422 = vmatprep.subr.bf16.mxu0 %v4418_v5  ;;  %3417 = vmatpush3.bf16.msra.mxu1 %v3749_v30 }
 0x211   : > { %3428 = vmatprep.subr.bf16.mxu1 %v4418_v5 }
 0x212   : > { %1172 = vmatmul.mubr.bf16.vlgmr.msra.gmra.mrb[0].mxu0 %v961_v28 }
 0x213   : > { %3424 = vmatprep.mubr.msk.bf16.mxu0 %vm4419_vm0, %v4418_v5  ;;  %3419 = vmatmul.mubr.bf16.vlgmr.msra.gmra.mrb[0].mxu1 %v961_v28 }
 0x214   : > { %3430 = vmatprep.mubr.msk.bf16.mxu1 %vm4419_vm0, %v4418_v5 }
 0x2e5   : > { %v1173_v37 = vpop.f32.mrb[0].mxu0 }
 0x2e6   : > { %v1175_v38 = vpop.f32.mrb[1].mxu0  ;;  %v1174_v47 = vadd.f32 %v1173_v37, %v999_v42  ;;  %v1216_v54 = vpop.f32.mrb[0].mxu1 }
 0x2e7   : > { %v1176_v39 = vadd.f32 %v1175_v38, %v1003_v35  ;;  %v1177_v40 = vpop.f32.mrb[2].mxu0  ;;  %v1217_v55 = vadd.f32 %v1216_v54, %v1007_v53  ;;  %v3420_v56 = vpop.f32.mrb[1].mxu1 }
 0x2e8   : > { %v1179_v41 = vpop.f32.mrb[3].mxu0  ;;  %v1178_v49 = vadd.f32 %v1177_v40, %v999_v42  ;;  %v5150_v50 = vpack.c.bf16 %v1174_v47, %v1174_v47  ;;  %v1219_v57 = vpop.f32.mrb[2].mxu1 }
 0x2e9   : > { %v5138_v43 = vpack.c.bf16 %v1176_v39, %v1176_v39  ;;  %v1180_v44 = vadd.f32 %v1179_v41, %v1003_v35  ;;  %v1220_v58 = vadd.f32 %v1219_v57, %v1007_v53  ;;  %v3421_v59 = vpop.f32.mrb[3].mxu1  ;;  %v5163_v60 = vpack.c.bf16 %v1217_v55, %v1217_v55 }
 0x2ea   : > { %v5152_v51 = vpack.c.bf16 %v1178_v49, %v1178_v49 }
 0x2eb   : > { %v5140_v45 = vpack.c.bf16 %v1180_v44, %v1180_v44  ;;  %v1246_v46 = vsel %vm1241_vm1, %v5138_v43, 0  ;;  %v5165_v61 = vpack.c.bf16 %v1220_v58, %v1220_v58  ;;  %v1364_v62 = vsel %vm1362_vm2, %v5163_v60, 0 }
 0x2ec   : > { %3423 = vmatpush3.bf16.xpose.msra.mxu0 %v1246_v46 }
 0x2ed   : > { %1509 = vrot.lane.b32.xlu1 %v5140_v45, %s4420_s18  ;;  %v1292_v48 = vsel %vm1241_vm1, %v5140_v45, 0  ;;  %3434 = vmatprep.subr.bf16.mxu0 %v4418_v5  ;;  %v1410_v63 = vsel %vm1362_vm2, %v5165_v61, 0 }
 0x2ee   : > { %3429 = vmatpush3.bf16.xpose.msra.mxu1 %v1292_v48 }
 0x2ef   : > { %3440 = vmatprep.subr.bf16.mxu1 %v4418_v5 }
 0x2f3   : > { %3425 = vmatmul.mubr.msk.bf16.vlgmr.msra.gmra.mrb[4].mxu0 %vm1241_vm1, %v5150_v50 }
 0x2f4   : > { %3436 = vmatprep.mubr.msk.bf16.mxu0 %vm4419_vm0, %v4418_v5  ;;  %3435 = vmatpush3.bf16.msra.mxu0 %v1364_v62 }
 0x2f5   : > { %3431 = vmatmul.mubr.msk.bf16.vlgmr.msra.gmra.mrb[4].mxu1 %vm1241_vm1, %v5152_v51  ;;  %3446 = vmatprep.subr.bf16.mxu0 %v4418_v5 }
 0x2f6   : > { %3442 = vmatprep.mubr.msk.bf16.mxu1 %vm4419_vm0, %v4418_v5  ;;  %3441 = vmatpush3.bf16.msra.mxu1 %v1410_v63 }
 0x2f7   : > { %3452 = vmatprep.subr.bf16.mxu1 %v4418_v5 }
 0x35f   : > { %v1510_v22 = vpop.permute.xlu1 %1509 }
 0x360   : > { %v1515_v38 = vsel %vm1241_vm1, %v1510_v22, 0  ;;  %v3752_v22 = vld [vmem:[%s5037_s25 + $0x10] sm:$0xff]  }
 0x3c6   : > { %v1282_v0 = vpop.f32.mrb[4].mxu0 }
 0x3c7   : > { %v3426_v1 = vpop.f32.mrb[5].mxu0  ;;  %v1335_v2 = vsel %vm1334_vm3, %v1282_v0, -inf }
 0x3c8   : > { %v1328_v3 = vpop.f32.mrb[4].mxu1  ;;  %1336 = vmax.xlane.f32.xlu0 %v1335_v2  ;;  %v1285_v6 = vpop.f32.mrb[6].mxu0 }
 0x3c9   : > { %v3427_v7 = vpop.f32.mrb[7].mxu0  ;;  %v3432_v8 = vpop.f32.mrb[5].mxu1  ;;  %v1338_v11 = vsel %vm1334_vm3, %v1328_v3, -inf }
 0x3ca   : > { %v1331_v9 = vpop.f32.mrb[6].mxu1 }
 0x3cb   : > { %v3433_v10 = vpop.f32.mrb[7].mxu1 }
 0x3cc   : > { %1339 = vmax.xlane.f32.xlu0 %v1338_v11 }
 0x3e2   : > { %1459 = vrot.lane.b32.xlu0 %v5138_v43, %s4420_s18 }
 0x455   : > { %v1337_v12 = vpop.xlane.xlu0 %1336 }
 0x456   : > { %v1341_v13 = vsub.f32 %v1282_v0, %v1337_v12 }
 0x458   : > { %v1343_v14 = vmul.f32 1.442695, %v1341_v13 }
 0x459   : > { %v1340_v15 = vpop.xlane.xlu0 %1339 }
 0x45a   : > { %3798 = vpow2.f32 %v1343_v14  ;;  %v1342_v16 = vsub.f32 %v1328_v3, %v1340_v15 }
 0x45c   : > { %v1345_v17 = vmul.f32 1.442695, %v1342_v16 }
 0x45d   : > { %v1460_v29 = vpop.permute.xlu0 %1459 }
 0x45e   : > { %3800 = vpow2.f32 %v1345_v17  ;;  %v1465_v34 = vsel %vm1241_vm1, %v1460_v29, 0 }
 0x464   : > { %v3799_v18 = vpop.eup %3798 }
 0x465   : > { %v1347_v19 = vsel %vm1334_vm3, %v3799_v18, 0.0 }
 0x466   : > { %1348 = vadd.xlane.f32.xlu1 %v1347_v19 }
 0x468   : > { %v3801_v20 = vpop.eup %3800 }
 0x469   : > { %v1350_v21 = vsel %vm1334_vm3, %v3801_v20, 0.0 }
 0x46a   : > { %1351 = vadd.xlane.f32.xlu1 %v1350_v21 }
 0x47b   : > { %1457 = vrot.lane.b32.xlu1 %v5150_v50, %s4420_s18 }
 0x47f   : > { %1507 = vrot.lane.b32.xlu1 %v5152_v51, %s4420_s18 }
 0x4f3   : > { %v1349_v23 = vpop.xlane.xlu1 %1348 }
 0x4f4   : > { %3802 = vrcp.f32 %v1349_v23 }
 0x4f7   : > { %v1352_v24 = vpop.xlane.xlu1 %1351 }
 0x4f8   : > { %3804 = vrcp.f32 %v1352_v24 }
 0x4fb   : > { %v1458_v39 = vpop.permute.xlu1 %1457 }
 0x4fe   : > { %v3803_v27 = vpop.eup %3802 }
 0x4ff   : > { %v1355_v28 = vmul.f32 %v3803_v27, %v3799_v18  ;;  %v1508_v40 = vpop.permute.xlu1 %1507 }
 0x501   : > { %v1357_v30 = vpack.c.bf16 %v1355_v28, %v1355_v28  ;;  %v3750_v28 = vld [vmem:[%s5037_s25] sm:$0xff]  }
 0x502   : > { %v3805_v31 = vpop.eup %3804 }
 0x503   : > { %v1356_v35 = vmul.f32 %v3805_v31, %v3801_v20  ;;  %3437 = vmatmul.mubr.msk.bf16.vlgmr.msra.gmra.mrb[8].mxu0 %vm1334_vm3, %v1357_v30  ;;  %v3753_v30 = vld [vmem:[%s5037_s25 + $0x18] sm:$0xff]   ;;  %v3751_v31 = vld [vmem:[%s5037_s25 + $0x8] sm:$0xff]  }
 0x504   : > { %3447 = vmatpush3.bf16.xpose.msra.mxu0 %v1465_v34  ;;  %3448 = vmatprep.mubr.msk.bf16.mxu0 %vm4419_vm0, %v4418_v5 }
 0x505   : > { %v1358_v37 = vpack.c.bf16 %v1356_v35, %v1356_v35  ;;  %3458 = vmatprep.subr.bf16.mxu0 %v4418_v5 }
 0x507   : > { %3443 = vmatmul.mubr.msk.bf16.vlgmr.msra.gmra.mrb[8].mxu1 %vm1334_vm3, %v1358_v37 }
 0x508   : > { %3453 = vmatpush3.bf16.xpose.msra.mxu1 %v1515_v38  ;;  %3454 = vmatprep.mubr.msk.bf16.mxu1 %vm4419_vm0, %v4418_v5 }
 0x509   : > { %3464 = vmatprep.subr.bf16.mxu1 %v4418_v5 }
 0x50b   : > { %3449 = vmatmul.mubr.msk.bf16.vlgmr.msra.gmra.mrb[12].mxu0 %vm1241_vm1, %v1458_v39 }
 0x50c   : > { %3460 = vmatprep.mubr.msk.bf16.mxu0 %vm4419_vm0, %v4418_v5 }
 0x50f   : > { %3455 = vmatmul.mubr.msk.bf16.vlgmr.msra.gmra.mrb[12].mxu1 %vm1241_vm1, %v1508_v40 }
 0x510   : > { %3466 = vmatprep.mubr.msk.bf16.mxu1 %vm4419_vm0, %v4418_v5 }
 0x5d6   : > { %v5199_v41 = vpop.f32.mrb[8].mxu0 }
 0x5d7   : > { %v3438_v42 = vpop.f32.mrb[9].mxu0 }
 0x5d8   : > { %v1403_v44 = vpop.f32.mrb[10].mxu0 }
 0x5d9   : > { %v3439_v46 = vpop.f32.mrb[11].mxu0 }
 0x5da   : > { %v5201_v47 = vpop.f32.mrb[8].mxu1 }
 0x5db   : > { %v1452_v48 = vpack.c.bf16 %v5201_v47, %v5199_v41  ;;  %v3444_v49 = vpop.f32.mrb[9].mxu1 }
 0x5dc   : > { %v1449_v52 = vpop.f32.mrb[10].mxu1 }
 0x5dd   : > { %v3445_v53 = vpop.f32.mrb[11].mxu1 }
 0x5de   : > { %v1501_v54 = vpop.f32.mrb[12].mxu0 }
 0x5df   : > { %v3450_v55 = vpop.f32.mrb[13].mxu0  ;;  %v1557_v56 = vsel %vm1334_vm3, %v1501_v54, -inf }
 0x5e0   : > { %1558 = vmax.xlane.f32.xlu0 %v1557_v56  ;;  %v1504_v57 = vpop.f32.mrb[14].mxu0 }
 0x5e1   : > { %v3451_v58 = vpop.f32.mrb[15].mxu0 }
 0x5e2   : > { %v1551_v59 = vpop.f32.mrb[12].mxu1 }
 0x5e3   : > { %v3456_v62 = vpop.f32.mrb[13].mxu1  ;;  %v1560_v63 = vsel %vm1334_vm3, %v1551_v59, -inf }
 0x5e4   : > { %1561 = vmax.xlane.f32.xlu1 %v1560_v63  ;;  %v1554_v0 = vpop.f32.mrb[14].mxu1 }
 0x5e5   : > { %v3457_v1 = vpop.f32.mrb[15].mxu1 }
 0x5f5   : > { %1629 = vrot.lane.b32.xlu1 %v5165_v61, %s4420_s18 }
 0x5f9   : > { %1797 = vrot.lane.b32.xlu1 %v5138_v43, %s4421_s24 }
 0x5fd   : > { %1847 = vrot.lane.b32.xlu1 %v5140_v45, %s4421_s24 }
 0x601   : > { %1845 = vrot.lane.b32.xlu1 %v5152_v51, %s4421_s24 }
 0x66d   : > { %v1559_v2 = vpop.xlane.xlu0 %1558 }
 0x66e   : > { %v1563_v3 = vsub.f32 %v1501_v54, %v1559_v2 }
 0x670   : > { %v1565_v6 = vmul.f32 1.442695, %v1563_v3 }
 0x671   : > { %v1562_v7 = vpop.xlane.xlu1 %1561 }
 0x672   : > { %3806 = vpow2.f32 %v1565_v6  ;;  %v1564_v8 = vsub.f32 %v1551_v59, %v1562_v7 }
 0x674   : > { %v1567_v9 = vmul.f32 1.442695, %v1564_v8 }
 0x675   : > { %v1630_v10 = vpop.permute.xlu1 %1629 }
 0x676   : > { %3808 = vpow2.f32 %v1567_v9  ;;  %v1635_v11 = vsel %vm1362_vm2, %v1630_v10, 0 }
 0x677   : > { %3465 = vmatpush3.bf16.msra.mxu1 %v1635_v11 }
 0x678   : > { %3478 = vmatprep.subr.bf16.mxu1 %v4418_v5 }
 0x679   : > { %v1798_v34 = vpop.permute.xlu1 %1797 }
 0x67a   : > { %v1803_v49 = vsel %vm1241_vm1, %v1798_v34, 0 }
 0x67c   : > { %v3807_v12 = vpop.eup %3806 }
 0x67d   : > { %v1569_v13 = vsel %vm1334_vm3, %v3807_v12, 0.0  ;;  %v1848_v35 = vpop.permute.xlu1 %1847 }
 0x67e   : > { %1570 = vadd.xlane.f32.xlu0 %v1569_v13  ;;  %v1853_v37 = vsel %vm1241_vm1, %v1848_v35, 0 }
 0x680   : > { %v3809_v14 = vpop.eup %3808 }
 0x681   : > { %v1572_v15 = vsel %vm1334_vm3, %v3809_v14, 0.0  ;;  %v1846_v38 = vpop.permute.xlu1 %1845 }
 0x682   : > { %1573 = vadd.xlane.f32.xlu0 %v1572_v15 }
 0x698   : > { %1581 = vrot.lane.b32.xlu0 %v5163_v60, %s4420_s18 }
 0x69c   : > { %1795 = vrot.lane.b32.xlu0 %v5150_v50, %s4421_s24 }
 0x70b   : > { %v1571_v16 = vpop.xlane.xlu0 %1570 }
 0x70c   : > { %3810 = vrcp.f32 %v1571_v16 }
 0x70f   : > { %v1574_v17 = vpop.xlane.xlu0 %1573 }
 0x710   : > { %3812 = vrcp.f32 %v1574_v17 }
 0x713   : > { %v1582_v18 = vpop.permute.xlu0 %1581 }
 0x714   : > { %v1587_v19 = vsel %vm1362_vm2, %v1582_v18, 0 }
 0x715   : > { %3459 = vmatpush3.bf16.msra.mxu0 %v1587_v19 }
 0x716   : > { %v3811_v20 = vpop.eup %3810  ;;  %3470 = vmatprep.subr.bf16.mxu0 %v4418_v5 }
 0x717   : > { %v1577_v21 = vmul.f32 %v3811_v20, %v3807_v12  ;;  %v1796_v55 = vpop.permute.xlu0 %1795 }
 0x719   : > { %v1579_v23 = vpack.c.bf16 %v1577_v21, %v1577_v21 }
 0x71a   : > { %v3813_v24 = vpop.eup %3812 }
 0x71b   : > { %v1578_v27 = vmul.f32 %v3813_v24, %v3809_v14  ;;  %3461 = vmatmul.mubr.msk.bf16.vlgmr.msra.gmra.mrb[16].mxu0 %vm1334_vm3, %v1579_v23 }
 0x71c   : > { %3471 = vmatpush3.bf16.msra.mxu0 %v3752_v22  ;;  %3474 = vmatprep.mubr.msk.bf16.mxu0 %vm4419_vm0, %v4418_v5 }
 0x71d   : > { %v1580_v29 = vpack.c.bf16 %v1578_v27, %v1578_v27  ;;  %3472 = vmatprep.subr.bf16.mxu0 %v4418_v5 }
 0x71f   : > { %3467 = vmatmul.mubr.msk.bf16.vlgmr.msra.gmra.mrb[16].mxu1 %vm1334_vm3, %v1580_v29 }
 0x720   : > { %3479 = vmatpush3.bf16.msra.mxu1 %v3750_v28  ;;  %3482 = vmatprep.mubr.msk.bf16.mxu1 %vm4419_vm0, %v4418_v5 }
 0x721   : > { %3480 = vmatprep.subr.bf16.mxu1 %v4418_v5  ;;  %3473 = vmatpush3.bf16.msra.mxu0 %v3753_v30 }
 0x722   : > { %3486 = vmatprep.subr.bf16.mxu0 %v4418_v5 }
 0x724   : > { %3481 = vmatpush3.bf16.msra.mxu1 %v3751_v31 }
 0x725   : > { %3492 = vmatprep.subr.bf16.mxu1 %v4418_v5 }
 0x727   : > { %3483 = vmatmul.mubr.msk.bf16.vlgmr.msra.gmra.mrb[20].mxu1 %vm1241_vm1, %v1452_v48 }
 0x728   : > { %3494 = vmatprep.mubr.msk.bf16.mxu1 %vm4419_vm0, %v4418_v5 }
 0x72d   : > { %3493 = vmatpush3.bf16.xpose.msra.mxu1 %v1853_v37 }
 0x72e   : > { %3504 = vmatprep.subr.bf16.mxu1 %v4418_v5 }
 0x734   : > { %3495 = vmatmul.mubr.msk.bf16.vlgmr.msra.gmra.mrb[24].mxu1 %vm1241_vm1, %v1846_v38 }
 0x735   : > { %3506 = vmatprep.mubr.msk.bf16.mxu1 %vm4419_vm0, %v4418_v5 }
 0x7ee   : > { %v1623_v39 = vpop.f32.mrb[16].mxu0 }
 0x7ef   : > { %v3462_v40 = vpop.f32.mrb[17].mxu0 }
 0x7f0   : > { %v1626_v41 = vpop.f32.mrb[18].mxu0  ;;  %v3754_v40 = vld [vmem:[%s5037_s25 + $0x20] sm:$0xff]  }
 0x7f1   : > { %v3463_v42 = vpop.f32.mrb[19].mxu0 }
 0x7f2   : > { %v1671_v44 = vpop.f32.mrb[16].mxu1 }
 0x7f3   : > { %v1677_v46 = vpack.c.bf16 %v1671_v44, %v1623_v39  ;;  %v3468_v47 = vpop.f32.mrb[17].mxu1 }
 0x7f4   : > { %v1674_v48 = vpop.f32.mrb[18].mxu1  ;;  %v3755_v47 = vld [vmem:[%s5037_s25 + $0x28] sm:$0xff]  }
 0x7f5   : > { %v3469_v52 = vpop.f32.mrb[19].mxu1  ;;  %3475 = vmatmul.mubr.msk.bf16.vlgmr.msra.gmra.mrb[20].mxu0 %vm1241_vm1, %v1677_v46 }
 0x7f6   : > { %3487 = vmatpush3.bf16.xpose.msra.mxu0 %v1803_v49  ;;  %3488 = vmatprep.mubr.msk.bf16.mxu0 %vm4419_vm0, %v4418_v5 }
 0x7f7   : > { %3498 = vmatprep.subr.bf16.mxu0 %v4418_v5 }
 0x7fa   : > { %v1788_v53 = vpop.f32.mrb[20].mxu1 }
 0x7fb   : > { %v3484_v54 = vpop.f32.mrb[21].mxu1 }
 0x7fc   : > { %v1791_v56 = vpop.f32.mrb[22].mxu1 }
 0x7fd   : > { %v3485_v57 = vpop.f32.mrb[23].mxu1  ;;  %3489 = vmatmul.mubr.msk.bf16.vlgmr.msra.gmra.mrb[24].mxu0 %vm1241_vm1, %v1796_v55 }
 0x7fe   : > { %3500 = vmatprep.mubr.msk.bf16.mxu0 %vm4419_vm0, %v4418_v5 }
 0x807   : > { %v1889_v58 = vpop.f32.mrb[24].mxu1 }
 0x808   : > { %v3496_v59 = vpop.f32.mrb[25].mxu1  ;;  %v1898_v62 = vsel %vm1334_vm3, %v1889_v58, -inf }
 0x809   : > { %1899 = vmax.xlane.f32.xlu1 %v1898_v62  ;;  %v1892_v63 = vpop.f32.mrb[26].mxu1 }
 0x80a   : > { %v3497_v0 = vpop.f32.mrb[27].mxu1 }
 0x81a   : > { %1967 = vrot.lane.b32.xlu1 %v5165_v61, %s4421_s24 }
 0x81e   : > { %2081 = vrot.lane.b32.xlu1 %v5138_v43, %s4422_s12 }
 0x822   : > { %2131 = vrot.lane.b32.xlu1 %v5140_v45, %s4422_s12 }
 0x826   : > { %2129 = vrot.lane.b32.xlu1 %v5152_v51, %s4422_s12 }
 0x896   : > { %v1900_v1 = vpop.xlane.xlu1 %1899 }
 0x897   : > { %v1902_v6 = vsub.f32 %v1889_v58, %v1900_v1 }
 0x899   : > { %v1905_v7 = vmul.f32 1.442695, %v1902_v6 }
 0x89a   : > { %v1968_v2 = vpop.permute.xlu1 %1967 }
 0x89b   : > { %v1973_v3 = vsel %vm1362_vm2, %v1968_v2, 0  ;;  %3814 = vpow2.f32 %v1905_v7 }
 0x89c   : > { %3505 = vmatpush3.bf16.msra.mxu1 %v1973_v3 }
 0x89d   : > { %3518 = vmatprep.subr.bf16.mxu1 %v4418_v5 }
 0x89e   : > { %v2082_v28 = vpop.permute.xlu1 %2081 }
 0x89f   : > { %v2087_v30 = vsel %vm1241_vm1, %v2082_v28, 0 }
 0x8a2   : > { %v2132_v55 = vpop.permute.xlu1 %2131 }
 0x8a3   : > { %v2137_v62 = vsel %vm1241_vm1, %v2132_v55, 0 }
 0x8a5   : > { %v3815_v14 = vpop.eup %3814 }
 0x8a6   : > { %v1910_v17 = vsel %vm1334_vm3, %v3815_v14, 0.0  ;;  %v2130_v0 = vpop.permute.xlu1 %2129 }
 0x8c8   : > { %v1732_v8 = vpop.f32.mrb[20].mxu0 }
 0x8c9   : > { %v5269_v9 = vadd.f32 %v1788_v53, %v1732_v8  ;;  %v3476_v43 = vpop.f32.mrb[21].mxu0 }
 0x8ca   : > { %v1735_v10 = vpop.f32.mrb[22].mxu0 }
 0x8cb   : > { %v5271_v11 = vadd.f32 %v1791_v56, %v1735_v10  ;;  %v3477_v45 = vpop.f32.mrb[23].mxu0 }
 0x8d0   : > { %v1839_v12 = vpop.f32.mrb[24].mxu0 }
 0x8d1   : > { %v3490_v51 = vpop.f32.mrb[25].mxu0  ;;  %v1895_v13 = vsel %vm1334_vm3, %v1839_v12, -inf }
 0x8d2   : > { %1896 = vmax.xlane.f32.xlu0 %v1895_v13  ;;  %v1842_v15 = vpop.f32.mrb[26].mxu0 }
 0x8d3   : > { %v3491_v16 = vpop.f32.mrb[27].mxu0 }
 0x8d6   : > { %1911 = vadd.xlane.f32.xlu0 %v1910_v17 }
 0x95f   : > { %v1897_v18 = vpop.xlane.xlu0 %1896 }
 0x960   : > { %v1901_v19 = vsub.f32 %v1839_v12, %v1897_v18 }
 0x962   : > { %v1903_v20 = vmul.f32 1.442695, %v1901_v19 }
 0x963   : > { %v1912_v21 = vpop.xlane.xlu0 %1911 }
 0x964   : > { %3816 = vpow2.f32 %v1903_v20 }
 0x965   : > { %3818 = vrcp.f32 %v1912_v21 }
 0x96e   : > { %v3817_v22 = vpop.eup %3816 }
 0x96f   : > { %v3819_v23 = vpop.eup %3818  ;;  %v1907_v24 = vsel %vm1334_vm3, %v3817_v22, 0.0 }
 0x970   : > { %v1916_v27 = vmul.f32 %v3819_v23, %v3815_v14  ;;  %1908 = vadd.xlane.f32.xlu0 %v1907_v24 }
 0x972   : > { %v1918_v29 = vpack.c.bf16 %v1916_v27, %v1916_v27 }
 0x974   : > { %3507 = vmatmul.mubr.msk.bf16.vlgmr.msra.gmra.mrb[28].mxu1 %vm1334_vm3, %v1918_v29 }
 0x975   : > { %3519 = vmatpush3.bf16.xpose.msra.mxu1 %v2087_v30  ;;  %3520 = vmatprep.mubr.msk.bf16.mxu1 %vm4419_vm0, %v4418_v5 }
 0x976   : > { %3530 = vmatprep.subr.bf16.mxu1 %v4418_v5 }
 0x986   : > { %1919 = vrot.lane.b32.xlu0 %v5163_v60, %s4421_s24 }
 0x98a   : > { %2079 = vrot.lane.b32.xlu0 %v5150_v50, %s4422_s12 }
 0x9fd   : > { %v1909_v31 = vpop.xlane.xlu0 %1908 }
 0x9fe   : > { %3820 = vrcp.f32 %v1909_v31 }
 0xa01   : > { %v1920_v34 = vpop.permute.xlu0 %1919 }
 0xa02   : > { %v1925_v35 = vsel %vm1362_vm2, %v1920_v34, 0 }
 0xa03   : > { %3499 = vmatpush3.bf16.msra.mxu0 %v1925_v35  ;;  %v3756_v35 = vld [vmem:[%s5037_s25 + $0x30] sm:$0xff]  }
 0xa04   : > { %3510 = vmatprep.subr.bf16.mxu0 %v4418_v5 }
 0xa05   : > { %v2080_v37 = vpop.permute.xlu0 %2079 }
 0xa06   : > { %3521 = vmatmul.mubr.msk.bf16.vlgmr.msra.gmra.mrb[32].mxu1 %vm1241_vm1, %v2080_v37  ;;  %v3757_v37 = vld [vmem:[%s5037_s25 + $0x38] sm:$0xff]  }
 0xa07   : > { %3532 = vmatprep.mubr.msk.bf16.mxu1 %vm4419_vm0, %v4418_v5 }
 0xa08   : > { %v3821_v38 = vpop.eup %3820 }
 0xa09   : > { %v1915_v39 = vmul.f32 %v3821_v38, %v3817_v22 }
 0xa0b   : > { %v1917_v41 = vpack.c.bf16 %v1915_v39, %v1915_v39 }
 0xa0d   : > { %3501 = vmatmul.mubr.msk.bf16.vlgmr.msra.gmra.mrb[28].mxu0 %vm1334_vm3, %v1917_v41 }
 0xa0e   : > { %3511 = vmatpush3.bf16.msra.mxu0 %v3754_v40  ;;  %3514 = vmatprep.mubr.msk.bf16.mxu0 %vm4419_vm0, %v4418_v5 }
 0xa0f   : > { %3512 = vmatprep.subr.bf16.mxu0 %v4418_v5 }
 0xa12   : > { %3513 = vmatpush3.bf16.msra.mxu0 %v3755_v47 }
 0xa13   : > { %3524 = vmatprep.subr.bf16.mxu0 %v4418_v5 }
 0xa47   : > { %v2009_v50 = vpop.f32.mrb[28].mxu1 }
 0xa48   : > { %v3508_v42 = vpop.f32.mrb[29].mxu1 }
 0xa49   : > { %v2012_v44 = vpop.f32.mrb[30].mxu1 }
 0xa4a   : > { %v3509_v46 = vpop.f32.mrb[31].mxu1 }
 0xad9   : > { %v2123_v48 = vpop.f32.mrb[32].mxu1 }
 0xada   : > { %v3522_v49 = vpop.f32.mrb[33].mxu1  ;;  %v2179_v52 = vsel %vm1334_vm3, %v2123_v48, -inf }
 0xadb   : > { %2180 = vmax.xlane.f32.xlu0 %v2179_v52  ;;  %v2126_v53 = vpop.f32.mrb[34].mxu1 }
 0xadc   : > { %v3523_v54 = vpop.f32.mrb[35].mxu1 }
 0xae0   : > { %v1961_v56 = vpop.f32.mrb[28].mxu0 }
 0xae1   : > { %v2015_v57 = vpack.c.bf16 %v2009_v50, %v1961_v56  ;;  %v3502_v58 = vpop.f32.mrb[29].mxu0 }
 0xae2   : > { %v1964_v59 = vpop.f32.mrb[30].mxu0 }
 0xae3   : > { %v3503_v63 = vpop.f32.mrb[31].mxu0  ;;  %3515 = vmatmul.mubr.msk.bf16.vlgmr.msra.gmra.mrb[32].mxu0 %vm1241_vm1, %v2015_v57  ;;  %v3758_v59 = vld [vmem:[%s5046_s19] ss:$8 sps:$4 sm:$0xff]  }
 0xae4   : > { %3525 = vmatpush3.bf16.xpose.msra.mxu0 %v2137_v62  ;;  %3526 = vmatprep.mubr.msk.bf16.mxu0 %vm4419_vm0, %v4418_v5  ;;  %v3760_v62 = vld [vmem:[%s5046_s19 + $0x4] ss:$8 sps:$4 sm:$0xff]   ;;  %v3763_v63 = vld [vmem:[%s5046_s19 + $0x14] ss:$8 sps:$4 sm:$0xff]  }
 0xae5   : > { %3536 = vmatprep.subr.bf16.mxu0 %v4418_v5 }
 0xaeb   : > { %3527 = vmatmul.mubr.msk.bf16.vlgmr.msra.gmra.mrb[36].mxu0 %vm1241_vm1, %v2130_v0  ;;  %v3761_v0 = vld [vmem:[%s5046_s19 + $0x10] ss:$8 sps:$4 sm:$0xff]  }
 0xaec   : > { %3538 = vmatprep.mubr.msk.bf16.mxu0 %vm4419_vm0, %v4418_v5 }
 0xb68   : > { %v2181_v1 = vpop.xlane.xlu0 %2180 }
 0xb69   : > { %v2185_v2 = vsub.f32 %v2123_v48, %v2181_v1  ;;  %v3271_v48 = vld [vmem:[%s782_s28] ss:$0 sm:$0xff] }
 0xb6b   : > { %v2187_v3 = vmul.f32 1.442695, %v2185_v2 }
 0xb6d   : > { %3822 = vpow2.f32 %v2187_v3 }
 0xb77   : > { %v3823_v6 = vpop.eup %3822 }
 0xb78   : > { %v2191_v7 = vsel %vm1334_vm3, %v3823_v6, 0.0 }
 0xb79   : > { %2192 = vadd.xlane.f32.xlu0 %v2191_v7 }
 0xbb6   : > { %v2070_v8 = vpop.f32.mrb[32].mxu0 }
 0xbb7   : > { %v2077_v43 = vadd.f32 %v2070_v8, %v5269_v9  ;;  %v3516_v10 = vpop.f32.mrb[33].mxu0 }
 0xbb8   : > { %v2073_v45 = vpop.f32.mrb[34].mxu0  ;;  %v3764_v10 = vld [vmem:[%s5046_s19 + $0x20] ss:$8 sps:$4 sm:$0xff]  }
 0xbb9   : > { %v2078_v12 = vadd.f32 %v2073_v45, %v5271_v11  ;;  %v3517_v51 = vpop.f32.mrb[35].mxu0  ;;  %v3769_v45 = vld [vmem:[%s5046_s19 + $0x34] ss:$8 sps:$4 sm:$0xff]  }
 0xbba   : > { %v3772_v51 = vld [vmem:[%s5046_s19 + $0x44] ss:$8 sps:$4 sm:$0xff]  }
 0xbbe   : > { %v2173_v13 = vpop.f32.mrb[36].mxu0 }
 0xbbf   : > { %v3528_v14 = vpop.f32.mrb[37].mxu0  ;;  %v2182_v15 = vsel %vm1334_vm3, %v2173_v13, -inf }
 0xbc0   : > { %2183 = vmax.xlane.f32.xlu1 %v2182_v15  ;;  %v2176_v16 = vpop.f32.mrb[38].mxu0  ;;  %v3775_v14 = vld [vmem:[%s5046_s19 + $0x54] ss:$8 sps:$4 sm:$0xff]   ;;  %v3773_v15 = vld [vmem:[%s5046_s19 + $0x50] ss:$8 sps:$4 sm:$0xff]  }
 0xbc1   : > { %v3529_v17 = vpop.f32.mrb[39].mxu0  ;;  %v3776_v16 = vld [vmem:[%s5046_s19 + $0x60] ss:$8 sps:$4 sm:$0xff]  }
 0xbc2   : > { %v3778_v17 = vld [vmem:[%s5046_s19 + $0x64] ss:$8 sps:$4 sm:$0xff]  }
 0xbd1   : > { %2251 = vrot.lane.b32.xlu1 %v5165_v61, %s4422_s12 }
 0xc06   : > { %v2193_v23 = vpop.xlane.xlu0 %2192 }
 0xc4d   : > { %v2184_v18 = vpop.xlane.xlu1 %2183 }
 0xc4e   : > { %v2186_v19 = vsub.f32 %v2173_v13, %v2184_v18  ;;  %v3770_v13 = vld [vmem:[%s5046_s19 + $0x40] ss:$8 sps:$4 sm:$0xff]   ;;  %v3781_v18 = vld [vmem:[%s5046_s19 + $0x74] ss:$8 sps:$4 sm:$0xff]  }
 0xc50   : > { %v2189_v20 = vmul.f32 1.442695, %v2186_v19  ;;  %v3779_v19 = vld [vmem:[%s5046_s19 + $0x70] ss:$8 sps:$4 sm:$0xff]  }
 0xc51   : > { %v2252_v21 = vpop.permute.xlu1 %2251 }
 0xc52   : > { %3824 = vpow2.f32 %v2189_v20  ;;  %v2257_v9 = vsel %vm1362_vm2, %v2252_v21, 0  ;;  %v3782_v20 = vld [vmem:[%s5056_s3 + $0x40] sm:$0xff]  }
 0xc53   : > { %3537 = vmatpush3.bf16.msra.mxu0 %v2257_v9  ;;  %3826 = vrcp.f32 %v2193_v23  ;;  %v3783_v21 = vld [vmem:[%s5056_s3] sm:$0xff]   ;;  %v3784_v9 = vld [vmem:[%s5056_s3 + $0x48] sm:$0xff]   ;;  %v3787_v23 = vld [vmem:[%s5056_s3 + $0x10] sm:$0xff]  }
 0xc54   : > { %2524 = vmatprep.subr.bf16.mxu0 %v3760_v62 }
 0xc5c   : > { %v3825_v11 = vpop.eup %3824 }
 0xc5d   : > { %v2194_v22 = vsel %vm1334_vm3, %v3825_v11, 0.0  ;;  %v3827_v24 = vpop.eup %3826 }
 0xc5e   : > { %2195 = vadd.xlane.f32.xlu0 %v2194_v22  ;;  %v2199_v27 = vmul.f32 %v3827_v24, %v3823_v6  ;;  %v3786_v22 = vld [vmem:[%s5056_s3 + $0x50] sm:$0xff]   ;;  %v3788_v24 = vld [vmem:[%s5056_s3 + $0x58] sm:$0xff]  }
 0xc60   : > { %v2201_v30 = vpack.c.bf16 %v2199_v27, %v2199_v27  ;;  %v3790_v27 = vld [vmem:[%s5056_s3 + $0x60] sm:$0xff]  }
 0xc74   : > { %2203 = vrot.lane.b32.xlu0 %v5163_v60, %s4422_s12 }
 0xceb   : > { %v2196_v61 = vpop.xlane.xlu0 %2195 }
 0xcec   : > { %3828 = vrcp.f32 %v2196_v61  ;;  %v3789_v61 = vld [vmem:[%s5056_s3 + $0x18] sm:$0xff]  }
 0xcef   : > { %v2204_v28 = vpop.permute.xlu0 %2203 }
 0xcf0   : > { %v2209_v29 = vsel %vm1362_vm2, %v2204_v28, 0  ;;  %v3791_v28 = vld [vmem:[%s5056_s3 + $0x20] sm:$0xff]  }
 0xcf1   : > { %3531 = vmatpush3.bf16.msra.mxu1 %v2209_v29  ;;  %v3792_v29 = vld [vmem:[%s5056_s3 + $0x68] sm:$0xff]  }
 0xcf2   : > { %3542 = vmatprep.subr.bf16.mxu1 %v4418_v5 }
 0xcf4   : > { %3533 = vmatmul.mubr.msk.bf16.vlgmr.msra.gmra.mrb[36].mxu1 %vm1334_vm3, %v2201_v30 }
 0xcf5   : > { %3546 = vmatprep.mubr.msk.bf16.mxu1 %vm4419_vm0, %v4418_v5  ;;  %3543 = vmatpush3.bf16.msra.mxu1 %v3756_v35 }
 0xcf6   : > { %v3829_v60 = vpop.eup %3828  ;;  %3544 = vmatprep.subr.bf16.mxu1 %v4418_v5 }
 0xcf7   : > { %v2200_v31 = vmul.f32 %v3829_v60, %v3825_v11  ;;  %v3785_v11 = vld [vmem:[%s5056_s3 + $0x8] sm:$0xff]  }
 0xcf9   : > { %v2202_v34 = vpack.c.bf16 %v2200_v31, %v2200_v31  ;;  %3545 = vmatpush3.bf16.msra.mxu1 %v3757_v37 }
 0xcfa   : > { %3380 = vmatprep.subr.bf16.mxu1 %v3782_v20 }
 0xcfb   : > { %3539 = vmatmul.mubr.msk.bf16.vlgmr.msra.gmra.mrb[40].mxu0 %vm1334_vm3, %v2202_v34 }
 0xcfc   : > { %2556 = vmatprep.mubr.bf16.mxu0 %v4417_v4  ;;  %2525 = vmatpush1.bf16.msra.mxu0 %v3758_v59 }
 0xcfd   : > { %2526 = vmatprep.subr.bf16.mxu0 %v3763_v63 }
 0xd00   : > { %2527 = vmatpush1.bf16.msra.mxu0 %v3761_v0 }
 0xdc7   : > { %v2245_v38 = vpop.f32.mrb[36].mxu1 }
 0xdc8   : > { %v3534_v39 = vpop.f32.mrb[37].mxu1 }
 0xdc9   : > { %v2248_v40 = vpop.f32.mrb[38].mxu1  ;;  %v3272_v39 = vld [vmem:[%s825_s23] ss:$0 sm:$0xff] }
 0xdca   : > { %v3535_v41 = vpop.f32.mrb[39].mxu1 }
 0xdce   : > { %v2293_v50 = vpop.f32.mrb[40].mxu0 }
 0xdcf   : > { %v2299_v42 = vpack.c.bf16 %v2293_v50, %v2245_v38  ;;  %v3540_v44 = vpop.f32.mrb[41].mxu0 }
 0xdd0   : > { %v2296_v46 = vpop.f32.mrb[42].mxu0  ;;  %v3273_v44 = vld [vmem:[%s833_s8] ss:$0 sm:$0xff] }
 0xdd1   : > { %v3541_v47 = vpop.f32.mrb[43].mxu0  ;;  %3547 = vmatmul.mubr.msk.bf16.vlgmr.msra.gmra.mrb[40].mxu1 %vm1241_vm1, %v2299_v42 }
 0xdd2   : > { %3381 = vmatpush3.bf16.msra.mxu1 %v3783_v21 }
 0xdd3   : > { %3382 = vmatprep.subr.bf16.mxu1 %v3784_v9 }
 0xdd6   : > { %3383 = vmatpush3.bf16.msra.mxu1 %v3785_v11 }
 0xdd7   : > { %3384 = vmatprep.subr.bf16.mxu1 %v3786_v22 }
 0xdda   : > { %3385 = vmatpush3.bf16.msra.mxu1 %v3787_v23 }
 0xddb   : > { %3386 = vmatprep.subr.bf16.mxu1 %v3788_v24 }
 0xdde   : > { %3387 = vmatpush3.bf16.msra.mxu1 %v3789_v61 }
 0xddf   : > { %3388 = vmatprep.subr.bf16.mxu1 %v3790_v27 }
 0xde2   : > { %3389 = vmatpush3.bf16.msra.mxu1 %v3791_v28 }
 0xde3   : > { %3390 = vmatprep.subr.bf16.mxu1 %v3792_v29 }
 0xea4   : > { %v2354_v4 = vpop.f32.mrb[40].mxu1 }
 0xea5   : > { %v2361_v5 = vadd.f32 %v2354_v4, %v2077_v43  ;;  %v3548_v49 = vpop.f32.mrb[41].mxu1  ;;  %v3766_v43 = vld [vmem:[%s5046_s19 + $0x24] ss:$8 sps:$4 sm:$0xff]  }
 0xea6   : > { %v2357_v52 = vpop.f32.mrb[42].mxu1  ;;  %2528 = vmatprep.subr.bf16.mxu0 %v3766_v43  ;;  %v3794_v49 = vld [vmem:[%s5056_s3 + $0x70] sm:$0xff]  }
 0xea7   : > { %v2370_v53 = vadd.f32 %v3271_v48, %v2361_v5  ;;  %v2362_v54 = vadd.f32 %v2357_v52, %v2078_v12  ;;  %v3549_v55 = vpop.f32.mrb[43].mxu1  ;;  %2529 = vmatpush1.bf16.msra.mxu0 %v3764_v10  ;;  %v3767_v12 = vld [vmem:[%s5046_s19 + $0x30] ss:$8 sps:$4 sm:$0xff]  }
 0xea8   : > { %2530 = vmatprep.subr.bf16.mxu0 %v3769_v45  ;;  %v3793_v5 = vld [vmem:[%s5056_s3 + $0x28] sm:$0xff]   ;;  %v3795_v52 = vld [vmem:[%s5056_s3 + $0x30] sm:$0xff]   ;;  %v2432_v55 = vld [vmem:[%s5053_s17] sm:$0x3] }
 0xea9   : > { %v2371_v56 = vadd.f32 %v3271_v48, %v2362_v54  ;;  %v2372_v57 = vadd.f32 %v2370_v53, %v5108_v25  ;;  %3391 = vmatpush3.bf16.msra.mxu1 %v3793_v5  ;;  %v3796_v53 = vld [vmem:[%s5056_s3 + $0x78] sm:$0xff]  }
 0xeaa   : > { %3392 = vmatprep.subr.bf16.mxu1 %v3794_v49  ;;  %v3797_v54 = vld [vmem:[%s5056_s3 + $0x38] sm:$0xff]  }
 0xeab   : > { %2376 = vadd.xlane.f32.xlu1 %v2372_v57  ;;  %v2373_v58 = vadd.f32 %v2371_v56, %v5110_v26  ;;  %2531 = vmatpush1.bf16.msra.mxu0 %v3767_v12  ;;  %v2437_v56 = vrot.slane %v2432_v55, %v998_v36 }
 0xeac   : > { %2532 = vmatprep.subr.bf16.mxu0 %v3772_v51 }
 0xead   : > { %2378 = vadd.xlane.f32.xlu0 %v2373_v58  ;;  %3393 = vmatpush3.bf16.msra.mxu1 %v3795_v52 }
 0xeae   : > { %3394 = vmatprep.subr.bf16.mxu1 %v3796_v53 }
 0xeaf   : > { %2533 = vmatpush1.bf16.msra.mxu0 %v3770_v13 }
 0xeb0   : > { %2534 = vmatprep.subr.bf16.mxu0 %v3775_v14 }
 0xeb1   : > { %3395 = vmatpush3.bf16.msra.mxu1 %v3797_v54 }
 0xeb3   : > { %2535 = vmatpush1.bf16.msra.mxu0 %v3773_v15 }
 0xeb4   : > { %2536 = vmatprep.subr.bf16.mxu0 %v3778_v17 }
 0xeb7   : > { %2537 = vmatpush1.bf16.msra.mxu0 %v3776_v16 }
 0xeb8   : > { %2538 = vmatprep.subr.bf16.mxu0 %v3781_v18 }
 0xebb   : > { %2539 = vmatpush1.bf16.msra.mxu0 %v3779_v19 }
 0xf38   : > { %v2377_v1 = vpop.xlane.xlu1 %2376 }
 0xf39   : > { %v2381_v2 = vmul.f32 0.0078125, %v2377_v1 }
 0xf3a   : > { %v2379_v3 = vpop.xlane.xlu0 %2378 }
 0xf3b   : > { %v5335_v25 = vsub.f32 %v2372_v57, %v2381_v2  ;;  %v2382_v26 = vmul.f32 0.0078125, %v2379_v3  ;;  %v2441_v57 = vrot.slane %v2432_v55, %v1002_v33 }
 0xf3d   : > { %v5337_v6 = vsub.f32 %v2373_v58, %v2382_v26  ;;  %v2385_v7 = vmul.f32 %v5335_v25, %v5335_v25 }
 0xf3f   : > { %2387 = vadd.xlane.f32.xlu0 %v2385_v7  ;;  %v2386_v8 = vmul.f32 %v5337_v6, %v5337_v6 }
 0xf41   : > { %2389 = vadd.xlane.f32.xlu1 %v2386_v8 }
 0xfcc   : > { %v2388_v30 = vpop.xlane.xlu0 %2387 }
 0xfcd   : > { %v2391_v60 = vmul.f32 0.0078125, %v2388_v30 }
 0xfce   : > { %v2390_v31 = vpop.xlane.xlu1 %2389 }
 0xfcf   : > { %v2393_v34 = vadd.f32 1e-05, %v2391_v60  ;;  %v2392_v35 = vmul.f32 0.0078125, %v2390_v31  ;;  %v3307_v60 = vld [vmem:[%s841_s21] ss:$0 sm:$0xff] }
 0xfd1   : > { %3830 = vrsqrt.f32 %v2393_v34  ;;  %v2394_v37 = vadd.f32 1e-05, %v2392_v35  ;;  %v3308_v35 = vld [vmem:[%s849_s30] ss:$0 sm:$0xff] }
 0xfd3   : > { %3832 = vrsqrt.f32 %v2394_v37 }
 0xfdb   : > { %v3831_v38 = vpop.eup %3830 }
 0xfdc   : > { %v2397_v40 = vmul.f32 %v3831_v38, %v5335_v25 }
 0xfdd   : > { %v3833_v41 = vpop.eup %3832 }
 0xfde   : > { %v2398_v50 = vmul.f32 %v3833_v41, %v5337_v6  ;;  %v2405_v42 = vmul.f32 %v3272_v39, %v2397_v40 }
 0xfe0   : > { %v2406_v46 = vmul.f32 %v3272_v39, %v2398_v50  ;;  %v2413_v47 = vadd.f32 %v3273_v44, %v2405_v42 }
 0xfe2   : > { %v2414_v4 = vadd.f32 %v3273_v44, %v2406_v46 }
 0xfe4   : > { %v2415_v48 = vpack.c.bf16 %v2414_v4, %v2413_v47 }
 0xfe6   : > { %2557 = vmatmul.mubr.bf16.vlgmr.msra.gmra.mrb[44].mxu0 %v2415_v48 }
0x10b9   : > { %v2558_v58 = vpop.f32.mrb[44].mxu0 }
0x10ba   : > { %v2559_v59 = vadd.f32 %v2558_v58, %v2437_v56  ;;  %v2560_v62 = vpop.f32.mrb[45].mxu0 }
0x10bb   : > { %v2561_v63 = vadd.f32 %v2560_v62, %v2441_v57  ;;  %v2562_v0 = vpop.f32.mrb[46].mxu0 }
0x10bc   : > { %v2563_v1 = vadd.f32 %v2562_v0, %v2437_v56  ;;  %v2564_v2 = vpop.f32.mrb[47].mxu0  ;;  %v2567_v25 = vmax.f32 %v2559_v59, 0.0 }
0x10bd   : > { %v2565_v3 = vadd.f32 %v2564_v2, %v2441_v57  ;;  %v2568_v6 = vmax.f32 %v2561_v63, 0.0 }
0x10be   : > { %v2569_v26 = vmax.f32 %v2563_v1, 0.0 }
0x10bf   : > { %v2570_v7 = vmax.f32 %v2565_v3, 0.0 }
0x10c0   : > { %v2571_v8 = vpack.c.bf16 %v2569_v26, %v2567_v25 }
0x10c1   : > { %v2572_v43 = vpack.c.bf16 %v2570_v7, %v2568_v6 }
0x10c3   : > { %2740 = vmatprep.mubr.bf16.mxu1 %v2572_v43 }
0x10c4   : > { %2741 = vmatmul.mubr.bf16.vlgmr.msra.gmra.mrb[44].mxu1 %v2571_v8 }
0x1197   : > { %v3396_v36 = vpop.f32.mrb[44].mxu1 }
0x1198   : > { %v3397_v33 = vpop.f32.mrb[45].mxu1 }
0x1199   : > { %v3398_v10 = vadd.f32 %v3397_v33, %v3396_v36  ;;  %v3399_v45 = vpop.f32.mrb[46].mxu1 }
0x119a   : > { %v3400_v12 = vpop.f32.mrb[47].mxu1 }
0x119b   : > { %v2743_v51 = vadd.f32 %v3398_v10, %v3290_v32  ;;  %v3401_v13 = vadd.f32 %v3400_v12, %v3399_v45 }
0x119d   : > { %v2746_v14 = vadd.f32 %v3401_v13, %v3290_v32  ;;  %v2749_v15 = vadd.f32 %v2743_v51, %v2413_v47 }
0x119f   : > { %2753 = vadd.xlane.f32.xlu0 %v2749_v15  ;;  %v2750_v16 = vadd.f32 %v2746_v14, %v2414_v4 }
0x11a1   : > { %2755 = vadd.xlane.f32.xlu1 %v2750_v16 }
0x122c   : > { %v2754_v17 = vpop.xlane.xlu0 %2753 }
0x122d   : > { %v2757_v18 = vmul.f32 0.0078125, %v2754_v17 }
0x122e   : > { %v2756_v19 = vpop.xlane.xlu1 %2755 }
0x122f   : > { %v2759_v20 = vsub.f32 %v2749_v15, %v2757_v18  ;;  %v2758_v21 = vmul.f32 0.0078125, %v2756_v19 }
0x1231   : > { %v2760_v9 = vsub.f32 %v2750_v16, %v2758_v21  ;;  %v2761_v11 = vmul.f32 %v2759_v20, %v2759_v20 }
0x1233   : > { %2763 = vadd.xlane.f32.xlu0 %v2761_v11  ;;  %v2762_v22 = vmul.f32 %v2760_v9, %v2760_v9 }
0x1235   : > { %2765 = vadd.xlane.f32.xlu1 %v2762_v22 }
0x12c0   : > { %v2764_v23 = vpop.xlane.xlu0 %2763 }
0x12c1   : > { %v2767_v24 = vmul.f32 0.0078125, %v2764_v23 }
0x12c2   : > { %v2766_v61 = vpop.xlane.xlu1 %2765 }
0x12c3   : > { %v2769_v27 = vadd.f32 1e-05, %v2767_v24  ;;  %v2768_v28 = vmul.f32 0.0078125, %v2766_v61 }
0x12c5   : > { %3834 = vrsqrt.f32 %v2769_v27  ;;  %v2770_v29 = vadd.f32 1e-05, %v2768_v28 }
0x12c7   : > { %3836 = vrsqrt.f32 %v2770_v29 }
0x12cf   : > { %v3835_v30 = vpop.eup %3834 }
0x12d0   : > { %v2773_v31 = vmul.f32 %v3835_v30, %v2759_v20  ;;  %2794 = sbr.rel (%p3309_p8) target bundleno = 4825 (0x12d9), region = 148 }
0x12d1   : > { %v3837_v34 = vpop.eup %3836 }
0x12d2   : > { %v2781_v37 = vmul.f32 %v3307_v60, %v2773_v31  ;;  %v2774_v38 = vmul.f32 %v3837_v34, %v2760_v9 }
0x12d4   : > { %v2789_v39 = vadd.f32 %v3308_v35, %v2781_v37  ;;  %v2782_v40 = vmul.f32 %v3307_v60, %v2774_v38 }
0x12d6   : > { %v2790_v41 = vadd.f32 %v3308_v35, %v2782_v40  ;;  %2795 = vst [vmem:[#allocation2] sm:$0xff] (!%p3309_p8), %v2789_v39 }
0x12d8   : > { %2796 = vst [vmem:[#allocation2 + $0x8] sm:$0xff] %v2790_v41 }
0x12d9 PF: > { %s5547_s16 = sld [smem:[#allocation39_spill]] }
0x12df   : > { %p3310_p5 = scmp.ne.s32.totalorder %s5547_s16, 1 }
0x12e0   : > { %2803 = vadd.xlane.f32.xlu0 (!%p3310_p5), %v2789_v39  ;;  %v3311_v58 = vld [vmem:[#allocation24] ss:$0 sm:$0xff] (!%p3310_p5)  ;;  %v3312_v62 = vld [vmem:[#allocation26] ss:$0 sm:$0xff] (!%p3310_p5) }
0x12e1   : > { %2800 = sbr.rel (%p3310_p5) target bundleno = 5148 (0x141c), region = 152 }
0x12e4   : > { %2805 = vadd.xlane.f32.xlu0 (!%p3310_p5), %v2790_v41 }
0x136d   : > { %v2804_v50 = vpop.xlane.xlu0 %2803 }
0x136e   : > { %v2807_v42 = vmul.f32 0.0078125, %v2804_v50 }
0x1370   : > { %v2809_v44 = vsub.f32 %v2789_v39, %v2807_v42 }
0x1371   : > { %v2806_v46 = vpop.xlane.xlu0 %2805 }
0x1372   : > { %v2808_v47 = vmul.f32 0.0078125, %v2806_v46  ;;  %v2811_v4 = vmul.f32 %v2809_v44, %v2809_v44 }
0x1374   : > { %v2810_v48 = vsub.f32 %v2790_v41, %v2808_v47  ;;  %2813 = vadd.xlane.f32.xlu1 %v2811_v4 }
0x1376   : > { %v2812_v5 = vmul.f32 %v2810_v48, %v2810_v48 }
0x1378   : > { %2815 = vadd.xlane.f32.xlu1 %v2812_v5 }
0x1401   : > { %v2814_v49 = vpop.xlane.xlu1 %2813 }
0x1402   : > { %v2817_v52 = vmul.f32 0.0078125, %v2814_v49 }
0x1404   : > { %v2819_v53 = vadd.f32 1e-05, %v2817_v52 }
0x1405   : > { %v2816_v54 = vpop.xlane.xlu1 %2815 }
0x1406   : > { %3838 = vrsqrt.f32 %v2819_v53  ;;  %v2818_v55 = vmul.f32 0.0078125, %v2816_v54 }
0x1408   : > { %v2820_v56 = vadd.f32 1e-05, %v2818_v55 }
0x140a   : > { %3840 = vrsqrt.f32 %v2820_v56 }
0x1410   : > { %v3839_v57 = vpop.eup %3838 }
0x1411   : > { %v2823_v59 = vmul.f32 %v3839_v57, %v2809_v44 }
0x1413   : > { %v2831_v63 = vmul.f32 %v3311_v58, %v2823_v59 }
0x1414   : > { %v3841_v0 = vpop.eup %3840 }
0x1415   : > { %v2839_v1 = vadd.f32 %v3312_v62, %v2831_v63  ;;  %v2824_v2 = vmul.f32 %v3841_v0, %v2810_v48 }
0x1417   : > { %2841 = vst [vmem:[#allocation27] sm:$0xff] %v2839_v1  ;;  %v2832_v3 = vmul.f32 %v3311_v58, %v2824_v2 }
0x1419   : > { %v2840_v25 = vadd.f32 %v3312_v62, %v2832_v3 }
0x141b   : > { %2842 = vst [vmem:[#allocation27 + $0x8] sm:$0xff] %v2840_v25 }
0x141c PF: > { %s5548_s26 = sld [smem:[#allocation41_spill]]  ;;  %s4423_s25 = smov [#allocation27]  }
0x141d   : > { %s2852_s28 = sshll.u32 %s4423_s25, 4  ;;  %s2853_s28 = int_to_ptr.vmem [resolvable:$true] %s2852_s28 }
0x141e   : > { %s4286_s19 = scalar_lea.vmem %s2853_s28, 256  ;;  %p4293_p13 = scmp.lt.s32.totalorder %s2853_s28, %s2853_s28 }
0x141f   : > { %p4287_p10 = scmp.ne.s32.totalorder %s2853_s28, %s4286_s19  ;;  %p4294_p2 = scmp.lt.s32.totalorder %s4286_s19, %s4286_s19 }
0x1421   : > { %p4295_p12 = por %p4294_p2, %p4293_p13 }
0x1422   : > { %p3650_p4 = scmp.eq.s32.totalorder %s5548_s26, 1 }
0x1424   : > { %p4288_p0 = pnand %p4287_p10, %p3650_p4 }
0x1426   : > { %p4289_p7 = pneg %p4288_p0 }
0x1428   : > { %p4296_p6 = pnand %p4295_p12, %p4289_p7 }
0x142a   : > { %4299 = shalt.err (!%p4296_p6)
}
0x142b   : > { %s5549_s10 = sld [smem:[#allocation52_spill]] }
0x1431   : > { %s4300_s23 = scalar_lea.hbm %s5549_s10, 256 }
0x1432   : > { %p4301_p11 = scmp.ne.s32.totalorder %s5549_s10, %s4300_s23  ;;  %p4306_p9 = scmp.lt.u32.totalorder %s4300_s23, %s5549_s10 }
0x1434   : > { %p4302_p3 = pnand %p4301_p11, %p3650_p4 }
0x1436   : > { %p4303_p1 = pneg %p4302_p3 }
0x1438   : > { %p4308_p8 = pnand %p4306_p9, %p4303_p1 }
0x143a   : > { %4311 = shalt.err (!%p4308_p8)
}
0x143b   : > { %s4424_s13 = smov 128   ;;  %s4425_s18 = smov 8  }
0x143c   : > { %3593 = dma.vmem_to_hbm [thread:$0]  (%p3650_p4), %s2853_s28, 256, %s5549_s10, [#allocation5], %s4424_s13, %s4424_s13, %s4425_s18  }
0x143d   : > { %4369 = dma.done.wait (%p3650_p4), [#allocation5], 256  }
0x143e   : > { %4371 = vsyncadd (%p3650_p4), [#allocation5], 4294967040 }
0x143f PF: > { %s5550_s29 = sld [smem:[#allocation40_spill]]  ;;  %s5551_s18 = sld [smem:[#allocation37_spill]] }
0x1440   : > { %s5552_s19 = sld [smem:[#allocation38_spill]]  ;;  %s5553_s20 = sld [smem:[#allocation44_spill]] }
0x1441   : > { %s5554_s16 = sld [smem:[#allocation42_spill]]  ;;  %s5555_s21 = smov %s4390_s22 }
0x1445   : > { %s46_s23 = sadd.s32 1, %s5550_s29  }
0x1446   : > { %p43_p5 = scmp.ge.s32.totalorder %s46_s23, 4  }
0x1447   : > { %s5556_s22 = smov %s5554_s16 }
0x1448   :  { %45 = sbr.rel (!%p43_p5) target bundleno = 25 (0x19), region = 278 }
0x144f   :  { %2868 = vsyncpa [#allocation4], 1 }
0x1450   :  { %2870 = vsyncpa [#allocation4 + $0x1], 1 }
0x1451   :  { %2871 = vsyncpa [#allocation7], 1 }
0x1452   :  { %2873 = vsyncpa [#allocation7 + $0x1], 1 }
0x1453   :  { %2874 = vsyncpa [#allocation10], 1 }
0x1454   :  { %2876 = vsyncpa [#allocation10 + $0x1], 1 }
0x1455   :  { %2877 = vsyncpa [#allocation13], 1 }
0x1456   :  { %2879 = vsyncpa [#allocation13 + $0x1], 1 }
0x1457   :  { %2880 = vsyncpa [#allocation16], 1 }
0x1458   :  { %2882 = vsyncpa [#allocation16 + $0x1], 1 }
0x1459   :  { %2883 = vsyncpa [#allocation19], 1 }
0x145a   :  { %2885 = vsyncpa [#allocation19 + $0x1], 1 }
0x145b   :  { %2886 = vsyncpa [#allocation22], 1 }
0x145c   :  { %2888 = vsyncpa [#allocation22 + $0x1], 1 }
0x145d   :  { %2889 = vsyncpa [#allocation25], 1 }
0x145e   :  { %2890 = vsyncpa [#allocation5], 1 }
0x145f   :  { %2892 = vsyncpa [#allocation5 + $0x1], 1 }

</bundles_post_ra>
